<compile_context>
chip_gen: v6e
topology: v6e:2x2x1
jax: 0.10.0
libtpu: 0.0.40
codegen_flags: <defaults>
</compile_context>

<pallas_src>
import functools

import numpy as np
import jax
import jax.numpy as jnp
from jax import lax
from jax.experimental import pallas as pl
from jax.experimental.pallas import tpu as pltpu


# ----------------------------------------------------------------------------
# Pallas kernel: calculate_equal_test (blocked over pairs)
# ----------------------------------------------------------------------------
def _contrastive_block_kernel(cross_ref, pos_ref, neg_ref, w_ref, valid_ref,
                              out_ref, *, temp):
    """One grid step == G (misclassified-region, class) pairs.

    cross_ref / pos_ref / neg_ref : (G, P, C) f32 blocks
    w_ref                         : (G, 1, P) f32 block
    valid_ref                     : (G, 1, 1) f32 block (1.0 real pair, 0.0 pad)
    out_ref                       : (1, 8, 128) f32 lane-dense per-block partial
    """
    cross = cross_ref[...]            # [G, P, C]
    pos = pos_ref[...]                # [G, P, C]
    neg = neg_ref[...]                # [G, P, C]
    w = w_ref[...]                    # [G, 1, P]
    valid = valid_ref[...]            # [G, 1, 1]
    P = cross.shape[1]

    # Row L2 normalization via rsqrt (EUP slot).  Folding the column norms into
    # the matmul operands avoids a [P,1]->[1,P] relayout; identical to
    # dot / cross_norm / {pos,neg}_norm up to fp rounding.
    pos_hat = pos * lax.rsqrt(jnp.sum(pos * pos, axis=2, keepdims=True))
    neg_hat = neg * lax.rsqrt(jnp.sum(neg * neg, axis=2, keepdims=True))
    inv_tc = lax.rsqrt(jnp.sum(cross * cross, axis=2, keepdims=True)) * (1.0 / temp)

    # Fused pos/neg matmul: a single [P, 2P] result per pair.
    pn = jnp.concatenate([pos_hat, neg_hat], axis=1)            # [G, 2P, C]
    dots = jnp.einsum('gpc,gqc->gpq', cross, pn,
                      preferred_element_type=jnp.float32)       # [G, P, 2P]
    scores = jnp.exp(dots * inv_tc)                             # [G, P, 2P]

    pos_scores = scores[:, :, :P] * w                           # [G, P, P]
    neg_scores = scores[:, :, P:]                               # [G, P, P]

    sum_pos = jnp.sum(pos_scores, axis=2, keepdims=True)        # [G, P, 1]
    sum_neg = jnp.sum(neg_scores, axis=2, keepdims=True)        # [G, P, 1]
    ratio = sum_neg * pl.reciprocal(sum_pos, approx=True)       # EUP vrcp
    # padded pairs are built from all-ones features -> finite ratio; valid==0
    # zeroes their contribution exactly.
    block_sum = jnp.sum(jnp.log(ratio + 1.0) * valid)           # scalar

    out_ref[...] = jnp.broadcast_to(block_sum.astype(out_ref.dtype),
                                    out_ref.shape)


def _pick_pairs_per_block(P, C, max_pairs=8, vmem_budget_bytes=6 << 20):
    """Pairs per grid step, budgeted against double-buffered f32 inputs so the
    kernel stays within the default scoped-VMEM limit on v5e/v6e/v7x."""
    per_pair = 2 * (3 * P * C + P + 1) * 4   # 3 features + weight + valid, x2 buf
    return max(1, min(max_pairs, vmem_budget_bytes // per_pair))


def contrastive_logits_pallas(cross_feature, pos_feature, neg_feature,
                              pos_weight_set, temp, *, pairs_per_block=None):
    """cross/pos/neg: [count, P, C] f32 ; pos_weight_set: [count, 1, P] f32."""
    cross_feature = np.asarray(cross_feature, np.float32)
    pos_feature = np.asarray(pos_feature, np.float32)
    neg_feature = np.asarray(neg_feature, np.float32)
    pos_weight_set = np.asarray(pos_weight_set, np.float32)

    count, P, C = cross_feature.shape
    G = pairs_per_block if pairs_per_block is not None else _pick_pairs_per_block(P, C)
    G = max(1, min(int(G), count))
    num_blocks = int(pl.cdiv(count, G))
    pad = num_blocks * G - count

    def _pad_ones(x):
        if pad == 0:
            return x
        return np.concatenate([x, np.ones((pad,) + x.shape[1:], x.dtype)], axis=0)

    cross_p = _pad_ones(cross_feature)
    pos_p = _pad_ones(pos_feature)
    neg_p = _pad_ones(neg_feature)
    w_p = _pad_ones(pos_weight_set)
    valid = np.concatenate(
        [np.ones((count, 1, 1), np.float32),
         np.zeros((pad, 1, 1), np.float32)], axis=0)

    kernel = functools.partial(_contrastive_block_kernel, temp=float(temp))
    out = pl.pallas_call(
        kernel,
        out_shape=jax.ShapeDtypeStruct((num_blocks, 8, 128), jnp.float32),
        grid_spec=pltpu.PrefetchScalarGridSpec(
            num_scalar_prefetch=0,
            grid=(num_blocks,),
            in_specs=[
                pl.BlockSpec((G, P, C), lambda i: (i, 0, 0)),
                pl.BlockSpec((G, P, C), lambda i: (i, 0, 0)),
                pl.BlockSpec((G, P, C), lambda i: (i, 0, 0)),
                pl.BlockSpec((G, 1, P), lambda i: (i, 0, 0)),
                pl.BlockSpec((G, 1, 1), lambda i: (i, 0, 0)),
            ],
            out_specs=pl.BlockSpec((1, 8, 128), lambda i: (i, 0, 0)),
        ),
        compiler_params=pltpu.CompilerParams(
            dimension_semantics=("parallel",),          # both TCs on v7x
            vmem_limit_bytes=32 * 1024 * 1024),
    )(jnp.asarray(cross_p), jnp.asarray(pos_p), jnp.asarray(neg_p),
      jnp.asarray(w_p), jnp.asarray(valid))
    # Cheap final reduction of per-block partials outside the kernel.
    return jnp.sum(out[:, 0, 0])


# ----------------------------------------------------------------------------
# Host-side glue (data-dependent shapes): interpolation, cross_class, reform
# ----------------------------------------------------------------------------
# TODO(synk): torch.unique / torch.nonzero based region mining has dynamic
# shapes and stays as host-side numpy preprocessing (no clean Pallas mapping).
def _reform(x, cal_size):
    # x: [d, n]  ->  [d, cal_size] by tiling columns (matches module.reform).
    n = x.shape[1]
    step = cal_size // n
    rest = cal_size % n
    parts = [x] * step + [x[:, :rest]]
    return np.concatenate(parts, axis=1)


def _preprocess(cls_score, label, con_seg_logit, cal_size, cal_gate):
    cls_score = np.asarray(cls_score, np.float32)      # [b, ncls, h, w]
    label = np.asarray(label)                          # [b, 1, h, w]
    con = np.asarray(con_seg_logit, np.float32)        # [b, c, h1, w1]
    b, ncls, h, w = cls_score.shape
    _, c, h1, w1 = con.shape

    # F.interpolate(..., mode='nearest') down-sampling index maps.
    ih = np.floor(np.arange(h1) * (h / h1)).astype(np.int64)
    iw = np.floor(np.arange(w1) * (w / w1)).astype(np.int64)
    gt_seg = label[:, 0][:, ih][:, :, iw].astype(np.int64)        # [b, h1, w1]
    cls_small = cls_score[:, :, ih][:, :, :, iw]                  # [b, ncls, h1, w1]

    cls_result = np.argmax(cls_small, axis=1) + 1
    lab = gt_seg + 1
    diff = (cls_result == lab).astype(np.int64)
    invert_diff = 1 - diff

    # pos_weight = softmax(cls_score, 1).max(1)[0]
    e = np.exp(cls_small - cls_small.max(axis=1, keepdims=True))
    soft = e / e.sum(axis=1, keepdims=True)
    pos_weight = soft.max(axis=1).reshape(b, 1, h1 * w1)

    con_flat = con.reshape(b, c, h1 * w1)

    pos_list, w_list, neg_list, cross_list = [], [], [], []
    cross_length = 0
    for i in range(b):
        tt_class, tt_masks, ft_regions, cross_pairs = [], [], [], []
        for j in np.unique(lab[i]):
            j = int(j)
            if j == 256:
                continue
            tt = (cls_result[i] == j) * diff[i]
            ft = (cls_result[i] == j) * invert_diff[i]
            tt_masks.append(tt)
            tt_class.append(j)
            cls_ft = lab[i] * ft
            for k in np.unique(cls_ft):
                k = int(k)
                if k in (256, 255, 0):
                    continue
                ft_regions.append((lab[i] == k) * ft)
                cross_pairs.append((j, k))
        for pidx, (j, k) in enumerate(cross_pairs):
            idx1 = tt_class.index(j)
            idx2 = tt_class.index(k)
            phi1 = np.nonzero(tt_masks[idx1].reshape(-1))[0]
            phi2 = np.nonzero(tt_masks[idx2].reshape(-1))[0]
            cross_idx = np.nonzero(ft_regions[pidx].reshape(-1))[0]
            n1, n2, ncx = len(phi1), len(phi2), len(cross_idx)
            if n2 * ncx == 0 or cal_gate[0] > ncx or cal_gate[1] < ncx:
                continue
            r_pos = _reform(con_flat[i][:, phi2], cal_size)        # [c, P]
            r_w = _reform(pos_weight[i][:, phi2], cal_size)        # [1, P]
            r_cross = _reform(con_flat[i][:, cross_idx], cal_size)
            if n1 == 0:
                r_neg = r_cross.copy()
            else:
                r_neg = _reform(con_flat[i][:, phi1], cal_size)
            cross_length += ncx
            pos_list.append(r_pos)
            w_list.append(r_w)
            neg_list.append(r_neg)
            cross_list.append(r_cross)

    count = len(pos_list)
    if count == 0:
        return None, None, None, None, 0, 0, cls_small, con_flat

    # cat(dim=2) + transpose(0, 2)  ==  stack of per-pair [P, c] blocks.
    cross_feature = np.stack([x.T for x in cross_list], axis=0).astype(np.float32)
    neg_feature = np.stack([x.T for x in neg_list], axis=0).astype(np.float32)
    pos_feature = np.stack([x.T for x in pos_list], axis=0).astype(np.float32)
    pos_weight_set = np.stack(w_list, axis=0).astype(np.float32)   # [count, 1, P]
    return (cross_feature, neg_feature, pos_feature, pos_weight_set,
            count, cross_length, cls_small, con_flat)


def _reference_logits(cross, neg, pos, w, temp):
    # Pure-numpy calculate_equal_test (used only by the __main__ self-test).
    cn = np.linalg.norm(cross, axis=2)
    pn = np.linalg.norm(pos, axis=2)
    nn = np.linalg.norm(neg, axis=2)
    pd = np.matmul(cross, np.transpose(pos, (0, 2, 1))) / temp
    nd = np.matmul(cross, np.transpose(neg, (0, 2, 1))) / temp
    ps = np.exp(pd / cn[:, :, None] / pn[:, None, :]) * w
    ns = np.exp(nd / cn[:, :, None] / nn[:, None, :])
    return np.log(ns.sum(2) / ps.sum(2) + 1.0).sum()


def reverse_contrastive_loss(cls_score, label, con_seg_logit, *,
                             loss_weight=0.1, temp=10.0,
                             cal_size=32, cal_gate=(0, 99)):
    (cross, neg, pos, wts, count, cross_length,
     cls_small, con_flat) = _preprocess(cls_score, label, con_seg_logit,
                                        cal_size, cal_gate)
    if count == 0:
        return (-jnp.sum(jnp.asarray(cls_small)) +
                jnp.sum(jnp.asarray(con_flat))) * 1e-16

    logits = contrastive_logits_pallas(cross, pos, neg, wts, temp)
    logits = logits / (((count * cal_size) ** 2) / cross_length)
    return loss_weight * logits


# ----------------------------------------------------------------------------
if __name__ == "__main__":
    key = jax.random.PRNGKey(0)
    b, n_cls, h, w = 2, 4, 16, 16
    c, h1, w1 = 32, 8, 8          # con_seg_logit at half resolution
    cal_size = 32                  # module's patch_size (kept small for the demo)

    k1, k2, k3 = jax.random.split(key, 3)
    cls_score = jax.random.normal(k1, (b, n_cls, h, w), jnp.float32)
    label = jax.random.randint(k2, (b, 1, h, w), 0, n_cls, jnp.int32)
    con_seg_logit = jax.random.normal(k3, (b, c, h1, w1), jnp.float32)

    loss = reverse_contrastive_loss(cls_score, label, con_seg_logit,
                                    loss_weight=0.1, temp=10.0,
                                    cal_size=cal_size, cal_gate=(0, 99))
    jax.block_until_ready(loss)

    # Correctness self-test (kept OUT of the production loss path per review).
    (cross, neg, pos, wts, count, cross_length, _, _) = _preprocess(
        np.asarray(cls_score), np.asarray(label), np.asarray(con_seg_logit),
        cal_size, (0, 99))
    if count:
        got = np.asarray(contrastive_logits_pallas(cross, pos, neg, wts, 10.0))
        ref = _reference_logits(cross, neg, pos, wts, 10.0)
        np.testing.assert_allclose(got, ref, rtol=1e-2, atol=1e-3)

    print("KERNEL_OK")
</pallas_src>

<mosaic_0001>
module attributes {stable_mosaic.version = 11 : i64} {
  func.func @_contrastive_block_kernel(%arg0: i32, %arg1: memref<8x32x32xf32, #tpu.memory_space<vmem>>, %arg2: memref<8x32x32xf32, #tpu.memory_space<vmem>>, %arg3: memref<8x32x32xf32, #tpu.memory_space<vmem>>, %arg4: memref<8x1x32xf32, #tpu.memory_space<vmem>>, %arg5: memref<8x1x1xf32, #tpu.memory_space<vmem>>, %arg6: memref<1x8x128xf32, #tpu.memory_space<vmem>>) attributes {dimension_semantics = [#tpu.dimension_semantics<parallel>], iteration_bounds = array<i64: 3>, scalar_prefetch = 0 : i64, scratch_operands = 0 : i64, tpu.core_type = #tpu.core_type<tc>, window_params = [{transform_indices = @transform_0, window_bounds = array<i64: 8, 32, 32>}, {transform_indices = @transform_1, window_bounds = array<i64: 8, 32, 32>}, {transform_indices = @transform_2, window_bounds = array<i64: 8, 32, 32>}, {transform_indices = @transform_3, window_bounds = array<i64: 8, 1, 32>}, {transform_indices = @transform_4, window_bounds = array<i64: 8, 1, 1>}, {transform_indices = @transform_5, window_bounds = array<i64: 1, 8, 128>}]} {
    %c0 = arith.constant 0 : index
    %c0_0 = arith.constant 0 : index
    %c0_1 = arith.constant 0 : index
    %0 = vector.load %arg1[%c0, %c0_0, %c0_1] : memref<8x32x32xf32, #tpu.memory_space<vmem>>, vector<8x32x32xf32>
    %c0_2 = arith.constant 0 : index
    %c0_3 = arith.constant 0 : index
    %c0_4 = arith.constant 0 : index
    %1 = vector.load %arg2[%c0_2, %c0_3, %c0_4] : memref<8x32x32xf32, #tpu.memory_space<vmem>>, vector<8x32x32xf32>
    %c0_5 = arith.constant 0 : index
    %c0_6 = arith.constant 0 : index
    %c0_7 = arith.constant 0 : index
    %2 = vector.load %arg3[%c0_5, %c0_6, %c0_7] : memref<8x32x32xf32, #tpu.memory_space<vmem>>, vector<8x32x32xf32>
    %c0_8 = arith.constant 0 : index
    %c0_9 = arith.constant 0 : index
    %c0_10 = arith.constant 0 : index
    %3 = vector.load %arg4[%c0_8, %c0_9, %c0_10] : memref<8x1x32xf32, #tpu.memory_space<vmem>>, vector<8x1x32xf32>
    %c0_11 = arith.constant 0 : index
    %c0_12 = arith.constant 0 : index
    %c0_13 = arith.constant 0 : index
    %4 = vector.load %arg5[%c0_11, %c0_12, %c0_13] : memref<8x1x1xf32, #tpu.memory_space<vmem>>, vector<8x1x1xf32>
    %5 = arith.mulf %1, %1 : vector<8x32x32xf32>
    %cst = arith.constant dense<0.000000e+00> : vector<8x32xf32>
    %6 = vector.multi_reduction <add>, %5, %cst [2] : vector<8x32x32xf32> to vector<8x32xf32>
    %7 = vector.shape_cast %6 : vector<8x32xf32> to vector<8x32x1xf32>
    %8 = math.rsqrt %7 : vector<8x32x1xf32>
    %9 = vector.broadcast %8 : vector<8x32x1xf32> to vector<8x32x32xf32>
    %10 = arith.mulf %1, %9 : vector<8x32x32xf32>
    %11 = arith.mulf %2, %2 : vector<8x32x32xf32>
    %cst_14 = arith.constant dense<0.000000e+00> : vector<8x32xf32>
    %12 = vector.multi_reduction <add>, %11, %cst_14 [2] : vector<8x32x32xf32> to vector<8x32xf32>
    %13 = vector.shape_cast %12 : vector<8x32xf32> to vector<8x32x1xf32>
    %14 = math.rsqrt %13 : vector<8x32x1xf32>
    %15 = vector.broadcast %14 : vector<8x32x1xf32> to vector<8x32x32xf32>
    %16 = arith.mulf %2, %15 : vector<8x32x32xf32>
    %17 = arith.mulf %0, %0 : vector<8x32x32xf32>
    %cst_15 = arith.constant dense<0.000000e+00> : vector<8x32xf32>
    %18 = vector.multi_reduction <add>, %17, %cst_15 [2] : vector<8x32x32xf32> to vector<8x32xf32>
    %19 = vector.shape_cast %18 : vector<8x32xf32> to vector<8x32x1xf32>
    %20 = math.rsqrt %19 : vector<8x32x1xf32>
    %cst_16 = arith.constant 1.000000e-01 : f32
    %21 = vector.broadcast %cst_16 : f32 to vector<8x32x1xf32>
    %22 = arith.mulf %20, %21 : vector<8x32x1xf32>
    %23 = tpu.concatenate %10, %16 in 1 : vector<8x32x32xf32>, vector<8x32x32xf32> -> vector<8x64x32xf32>
    "tpu.trace_start"() <{level = 10 : i32, message = "gpc,gqc->gpq"}> : () -> ()
    %cst_17 = arith.constant dense<0.000000e+00> : vector<8x32x64xf32>
    %24 = tpu.matmul %0, %23, %cst_17 {dimension_numbers = #tpu.dot_dimension_numbers<[2], [2], [1], [1], [0, 0, 0, 1, 1, 1], [0], [0]>} : vector<8x32x32xf32>, vector<8x64x32xf32>, vector<8x32x64xf32> -> vector<8x32x64xf32>
    "tpu.trace_stop"() : () -> ()
    %25 = vector.broadcast %22 : vector<8x32x1xf32> to vector<8x32x64xf32>
    %26 = arith.mulf %24, %25 : vector<8x32x64xf32>
    %27 = math.exp %26 : vector<8x32x64xf32>
    %28 = vector.extract_strided_slice %27 {offsets = [0, 0, 0], sizes = [8, 32, 32], strides = [1, 1, 1]} : vector<8x32x64xf32> to vector<8x32x32xf32>
    %29 = vector.broadcast %3 : vector<8x1x32xf32> to vector<8x32x32xf32>
    %30 = arith.mulf %28, %29 : vector<8x32x32xf32>
    %31 = vector.extract_strided_slice %27 {offsets = [0, 0, 32], sizes = [8, 32, 32], strides = [1, 1, 1]} : vector<8x32x64xf32> to vector<8x32x32xf32>
    %cst_18 = arith.constant dense<0.000000e+00> : vector<8x32xf32>
    %32 = vector.multi_reduction <add>, %30, %cst_18 [2] : vector<8x32x32xf32> to vector<8x32xf32>
    %33 = vector.shape_cast %32 : vector<8x32xf32> to vector<8x32x1xf32>
    %cst_19 = arith.constant dense<0.000000e+00> : vector<8x32xf32>
    %34 = vector.multi_reduction <add>, %31, %cst_19 [2] : vector<8x32x32xf32> to vector<8x32xf32>
    %35 = vector.shape_cast %34 : vector<8x32xf32> to vector<8x32x1xf32>
    %36 = tpu.reciprocal %33 {approx = true} : vector<8x32x1xf32> -> vector<8x32x1xf32>
    %37 = arith.mulf %35, %36 : vector<8x32x1xf32>
    %cst_20 = arith.constant 1.000000e+00 : f32
    %38 = vector.broadcast %cst_20 : f32 to vector<8x32x1xf32>
    %39 = arith.addf %37, %38 : vector<8x32x1xf32>
    %40 = math.log %39 : vector<8x32x1xf32>
    %41 = vector.broadcast %4 : vector<8x1x1xf32> to vector<8x32x1xf32>
    %42 = arith.mulf %40, %41 : vector<8x32x1xf32>
    %43 = vector.shape_cast %42 : vector<8x32x1xf32> to vector<1x8x32x1xf32>
    %cst_21 = arith.constant dense<0.000000e+00> : vector<1xf32>
    %44 = vector.multi_reduction <add>, %43, %cst_21 [1, 2, 3] : vector<1x8x32x1xf32> to vector<1xf32>
    %45 = vector.shape_cast %44 : vector<1xf32> to vector<1x1x1x1xf32>
    %46 = vector.extract %45[0, 0, 0, 0] : f32 from vector<1x1x1x1xf32>
    %47 = vector.broadcast %46 : f32 to vector<1x8x128xf32>
    %c0_22 = arith.constant 0 : index
    %c0_23 = arith.constant 0 : index
    %c0_24 = arith.constant 0 : index
    %48 = vector.load %arg6[%c0_22, %c0_23, %c0_24] : memref<1x8x128xf32, #tpu.memory_space<vmem>>, vector<1x8x128xf32>
    tpu.vector_store %arg6[%c0_22, %c0_23, %c0_24], %47 {strides = array<i32>} : memref<1x8x128xf32, #tpu.memory_space<vmem>>, vector<1x8x128xf32>,
    return
  }
  func.func @transform_0(%arg0: i32) -> (i32, i32, i32) {
    %c0_i32 = arith.constant 0 : i32
    %c0_i32_0 = arith.constant 0 : i32
    %c0_i32_1 = arith.constant 0 : i32
    return %arg0, %c0_i32, %c0_i32_0 : i32, i32, i32
  }
  func.func @transform_1(%arg0: i32) -> (i32, i32, i32) {
    %c0_i32 = arith.constant 0 : i32
    %c0_i32_0 = arith.constant 0 : i32
    %c0_i32_1 = arith.constant 0 : i32
    return %arg0, %c0_i32, %c0_i32_0 : i32, i32, i32
  }
  func.func @transform_2(%arg0: i32) -> (i32, i32, i32) {
    %c0_i32 = arith.constant 0 : i32
    %c0_i32_0 = arith.constant 0 : i32
    %c0_i32_1 = arith.constant 0 : i32
    return %arg0, %c0_i32, %c0_i32_0 : i32, i32, i32
  }
  func.func @transform_3(%arg0: i32) -> (i32, i32, i32) {
    %c0_i32 = arith.constant 0 : i32
    %c0_i32_0 = arith.constant 0 : i32
    %c0_i32_1 = arith.constant 0 : i32
    return %arg0, %c0_i32, %c0_i32_0 : i32, i32, i32
  }
  func.func @transform_4(%arg0: i32) -> (i32, i32, i32) {
    %c0_i32 = arith.constant 0 : i32
    %c0_i32_0 = arith.constant 0 : i32
    %c0_i32_1 = arith.constant 0 : i32
    return %arg0, %c0_i32, %c0_i32_0 : i32, i32, i32
  }
  func.func @transform_5(%arg0: i32) -> (i32, i32, i32) {
    %c0_i32 = arith.constant 0 : i32
    %c0_i32_0 = arith.constant 0 : i32
    %c0_i32_1 = arith.constant 0 : i32
    return %arg0, %c0_i32, %c0_i32_0 : i32, i32, i32
  }
}

</mosaic_0001>

<bundles_post_ra>
// kernel: tpu_custom_call.1
= control target key start
LH: loop header
LB: loop body
LE: loop exit
PB: predicated region body
PF: predicated region fallthrough
CT: control target
= control target key end

     0   :  { %s5459_s0 = inlined_call_operand.hbm [shape: f32[24,32,32], index: 0, kind: input, shape index: {}]   ;;  %s5460_s1 = inlined_call_operand.hbm [shape: f32[24,32,32], index: 1, kind: input, shape index: {}]   ;;  %s5461_s2 = inlined_call_operand.hbm [shape: f32[24,32,32], index: 2, kind: input, shape index: {}]   ;;  %s5462_s3 = inlined_call_operand.vmem [shape: f32[24,1,32], index: 3, kind: input, shape index: {}]   ;;  %s5463_s4 = inlined_call_operand.vmem [shape: f32[24,1,1], index: 4, kind: input, shape index: {}]   ;;  %s5464_s5 = inlined_call_operand.hbm [shape: f32[3,8,128], index: 5, kind: output, shape index: {}]  }
   0x1   :  { %5480 = sst [smem:[#allocation21_spill]] %s5459_s0 }
   0x2   :  { %5481 = sst [smem:[#allocation22_spill]] %s5460_s1 }
   0x3   :  { %10 = vsyncpa [#allocation3], 0 }
   0x4   :  { %12 = vsyncpa [#allocation3 + $0x1], 0 }
   0x5   :  { %13 = vsyncpa [#allocation6], 0 }
   0x6   :  { %15 = vsyncpa [#allocation6 + $0x1], 0 }
   0x7   :  { %16 = vsyncpa [#allocation4], 0 }
   0x8   :  { %18 = vsyncpa [#allocation4 + $0x1], 0  ;;  %s4047_s18 = smov 0   ;;  %s4049_s19 = smov 0  }
   0x9   :  { %s4051_s20 = smov 0   ;;  %s4053_s21 = smov 0  }
   0xa LB: > { %5482 = sst [smem:[#allocation12_spill]] %s4004_s20  ;;  %s4068_s22 = sadd.s32 4294967295, %s4008_s21   ;;  %s4008_s21 = sphi %s4053_s21, %s5518_s21   ;;  %s4004_s20 = sphi %s4051_s20, %s5515_s20   ;;  %s4000_s19 = sphi %s4049_s19, %s5517_s19   ;;  %s3996_s18 = sphi %s4047_s18, %s5516_s18  }
   0xb   : > { %s2977_s23 = sadd.s32 4294967294, %s4008_s21   ;;  %s4072_s24 = sadd.s32 1, %s4008_s21  }
   0xc   : > { %s31_s25 = sadd.s32 1, %s4004_s20  ;;  %s28_s26 = ssub.s32 %s4008_s21, %s4072_s24 }
   0xd   : > { %p38_p0 = scmp.ne.s32.totalorder %s4004_s20, %s4000_s19  ;;  %p29_p1 = scmp.eq.s32.totalorder %s28_s26, 0 }
   0xe   : > { %p39_p2 = scmp.eq.s32.totalorder %s4008_s21, 0  ;;  %p44_p3 = scmp.ne.s32.totalorder %s4000_s19, %s3996_s18 }
   0xf   : > { %p45_p4 = scmp.eq.s32.totalorder %s4068_s22, 0  ;;  %p172_p7 = scmp.eq.s32.totalorder %s4068_s22, 2 }
  0x10   : > { %s4084_s27 = scalar_select %p29_p1, %s4004_s20, %s31_s25  }
  0x11   : > { %p40_p5 = por %p39_p2, %p38_p0  ;;  %p4086_p6 = por %p45_p4, %p44_p3 }
  0x12   : > { %5483 = sst [smem:[#allocation13_spill]] %s4084_s27  ;;  %p178_p8 = scmp.eq.s32.totalorder %s2977_s23, 2 }
  0x13   : > { %s5484_s28 = scalar_select %p4086_p6, 1, 0 }
  0x14   : > { %p3417_p9 = scmp.lt.s32.totalorder %s4008_s21, 3  ;;  %p4092_p10 = por %p172_p7, %p38_p0 }
  0x15   : > { %p4096_p11 = por %p178_p8, %p44_p3  ;;  %s5465_s6 = sand.u32 1, %s4004_s20  }
  0x16   : > { %s5485_s29 = scalar_select %p4092_p10, 1, 0 }
  0x17   : > { %s5486_s30 = scalar_select %p4096_p11, 1, 0 }
  0x18   : > { %s4102_s7 = sshll.u32 %s4008_s21, 12  ;;  %s4106_s8 = sshll.u32 %s5465_s6, 8 }
  0x19   : > { %p4108_p12 = pnand %p3417_p9, %p40_p5  ;;  %s220_s10 = sand.u32 1, %s4008_s21  }
  0x1a   : > { %s5488_s1 = sld [smem:[#allocation22_spill]]  ;;  %s224_s14 = scalar_lea.vmem [#allocation5], %s4106_s8 }
  0x1b   : > { %s232_s15 = sshll.u32 %s224_s14, 4  ;;  %s4123_s16 = scalar_lea.sflag [#allocation6], %s220_s10  ;;  %s4120_s15 = int_to_ptr.vmem [resolvable:$true] %s232_s15 }
  0x1c   : > { %p4129_p1 = pneg %p4108_p12 }
  0x20   : > { %s4117_s13 = scalar_lea.hbm %s5488_s1, %s4102_s7  ;;  %s3861_s11 = scalar_lea.hbm %s5488_s1, 12288 }
  0x21   : > { %s3856_s17 = scalar_lea.hbm %s4117_s13, 4096  ;;  %p3862_p4 = scmp.lt.s32.totalorder %s4117_s13, %s5488_s1 }
  0x22   : > { %p3857_p0 = scmp.ne.s32.totalorder %s4117_s13, %s3856_s17  ;;  %p3863_p5 = scmp.lt.s32.totalorder %s3861_s11, %s3856_s17 }
  0x24   : > { %p3859_p2 = pnand %p4129_p1, %p3857_p0  ;;  %p3864_p7 = por %p3863_p5, %p3862_p4 }
  0x26   : > { %p3860_p3 = pneg %p3859_p2 }
  0x28   : > { %p3865_p8 = pnand %p3864_p7, %p3860_p3 }
  0x2a   : > { %3868 = shalt.err (!%p3865_p8)
}
  0x2b   : > { %s3869_s10 = scalar_lea.vmem %s4120_s15, 4096  ;;  %s4010_s6 = smov [#allocation5]  }
  0x2c   : > { %p3870_p9 = scmp.ne.s32.totalorder %s4120_s15, %s3869_s10  ;;  %s3874_s25 = sshll.u32 %s4010_s6, 4  ;;  %s3875_s25 = int_to_ptr.vmem [resolvable:$false] %s3874_s25 }
  0x2d   : > { %s3876_s26 = scalar_lea.vmem %s3875_s25, 8192  ;;  %p3877_p13 = scmp.lt.s32.totalorder %s4120_s15, %s3875_s25 }
  0x2e   : > { %p3872_p0 = pnand %p3870_p9, %p4129_p1  ;;  %p3878_p11 = scmp.lt.s32.totalorder %s3876_s26, %s3869_s10 }
  0x30   : > { %p3873_p2 = pneg %p3872_p0  ;;  %p3879_p10 = por %p3878_p11, %p3877_p13 }
  0x32   : > { %p3880_p6 = pnand %p3879_p10, %p3873_p2 }
  0x34   : > { %3883 = shalt.err (!%p3880_p6)
}
  0x35   : > { %s5468_s17 = smov 128   ;;  %s5470_s11 = smov 8  }
  0x36   : > { %3409 = dma.hbm_to_vmem [thread:$0]  (!%p4108_p12), %s4117_s13, 4096, %s4120_s15, %s4123_s16, %s5468_s17, %s5468_s17, %s5470_s11  }
  0x37   : > { %p278_p11 = scmp.lt.s32.totalorder %s4008_s21, 4  ;;  %s5490_s0 = sld [smem:[#allocation21_spill]] }
  0x38   : > { %p5491_p6 = scmp.ge.s32.totalorder %s4008_s21, 1  ;;  %s202_s25 = scalar_lea.vmem [#allocation2], %s4106_s8 }
  0x39   : > { %s210_s26 = sshll.u32 %s202_s25, 4  ;;  %s5493_s1 = sand.u32 1, %s4004_s20   ;;  %s4169_s26 = int_to_ptr.vmem [resolvable:$true] %s210_s26 }
  0x3a   : > { %p4164_p10 = pnand %p5491_p6, %p278_p11  ;;  %s199_s13 = scalar_lea.sflag [#allocation3], %s5493_s1 }
  0x3c   : > { %s5492_s10 = scalar_select %p4164_p10, 1, 0 }
  0x3d   : > { %s4160_s14 = scalar_lea.hbm %s5490_s0, %s4102_s7  ;;  %s3889_s17 = scalar_lea.hbm %s5490_s0, 12288 }
  0x3e   : > { %s3884_s15 = scalar_lea.hbm %s4160_s14, 4096  ;;  %p3890_p5 = scmp.lt.s32.totalorder %s4160_s14, %s5490_s0 }
  0x3f   : > { %p3885_p13 = scmp.ne.s32.totalorder %s4160_s14, %s3884_s15  ;;  %p3891_p7 = scmp.lt.s32.totalorder %s3889_s17, %s3884_s15 }
  0x41   : > { %p3887_p3 = pnand %p3885_p13, %p4129_p1  ;;  %p3892_p8 = por %p3891_p7, %p3890_p5 }
  0x43   : > { %p3888_p4 = pneg %p3887_p3 }
  0x45   : > { %p3893_p9 = pnand %p3892_p8, %p3888_p4 }
  0x47   : > { %3896 = shalt.err (!%p3893_p9)
}
  0x48   : > { %s3897_s1 = scalar_lea.vmem %s4169_s26, 4096  ;;  %s4013_s25 = smov [#allocation2]  }
  0x49   : > { %p3898_p0 = scmp.ne.s32.totalorder %s4169_s26, %s3897_s1  ;;  %s3902_s6 = sshll.u32 %s4013_s25, 4  ;;  %s3903_s6 = int_to_ptr.vmem [resolvable:$false] %s3902_s6 }
  0x4a   : > { %s3904_s12 = scalar_lea.vmem %s3903_s6, 8192  ;;  %p3905_p6 = scmp.lt.s32.totalorder %s4169_s26, %s3903_s6 }
  0x4b   : > { %p3900_p2 = pnand %p3898_p0, %p4129_p1  ;;  %p3906_p13 = scmp.lt.s32.totalorder %s3904_s12, %s3897_s1 }
  0x4d   : > { %p3901_p11 = pneg %p3900_p2  ;;  %p3907_p3 = por %p3906_p13, %p3905_p6 }
  0x4f   : > { %p3908_p10 = pnand %p3907_p3, %p3901_p11 }
  0x51   : > { %3911 = shalt.err (!%p3908_p10)
}
  0x52   : > { %s5494_s27 = smov 8   ;;  %s5495_s17 = smov 128  }
  0x53   : > { %3406 = dma.hbm_to_vmem [thread:$0]  (!%p4108_p12), %s4160_s14, 4096, %s4169_s26, %s199_s13, %s5495_s17, %s5495_s17, %s5494_s27  }
  0x54   : > { %s4200_s25 = scalar_lea.hbm %s5461_s2, %s4102_s7  ;;  %s246_s1 = scalar_lea.vmem [#allocation7], %s4106_s8 }
  0x55   : > { %s254_s6 = sshll.u32 %s246_s1, 4  ;;  %s3912_s12 = scalar_lea.hbm %s4200_s25, 4096  ;;  %s255_s6 = int_to_ptr.vmem [resolvable:$true] %s254_s6 }
  0x56   : > { %p3913_p10 = scmp.ne.s32.totalorder %s4200_s25, %s3912_s12  ;;  %s3917_s14 = scalar_lea.hbm %s5461_s2, 12288 }
  0x57   : > { %p3918_p7 = scmp.lt.s32.totalorder %s4200_s25, %s5461_s2  ;;  %p3919_p8 = scmp.lt.s32.totalorder %s3917_s14, %s3912_s12 }
  0x58   : > { %p3915_p4 = pnand %p3913_p10, %p4129_p1 }
  0x59   : > { %p3920_p9 = por %p3919_p8, %p3918_p7 }
  0x5a   : > { %p3916_p5 = pneg %p3915_p4 }
  0x5c   : > { %p3921_p0 = pnand %p3920_p9, %p3916_p5 }
  0x5e   : > { %3924 = shalt.err (!%p3921_p0)
}
  0x5f   : > { %s3925_s7 = scalar_lea.vmem %s255_s6, 4096  ;;  %s4014_s8 = smov [#allocation7]  }
  0x60   : > { %p3926_p2 = scmp.ne.s32.totalorder %s255_s6, %s3925_s7  ;;  %s3930_s11 = sshll.u32 %s4014_s8, 4  ;;  %s3931_s11 = int_to_ptr.vmem [resolvable:$false] %s3930_s11 }
  0x61   : > { %s3932_s15 = scalar_lea.vmem %s3931_s11, 8192  ;;  %p3933_p13 = scmp.lt.s32.totalorder %s255_s6, %s3931_s11 }
  0x62   : > { %p3928_p11 = pnand %p3926_p2, %p4129_p1  ;;  %p3934_p3 = scmp.lt.s32.totalorder %s3932_s15, %s3925_s7 }
  0x64   : > { %p3929_p6 = pneg %p3928_p11  ;;  %p3935_p10 = por %p3934_p3, %p3933_p13 }
  0x66   : > { %p3936_p4 = pnand %p3935_p10, %p3929_p6 }
  0x68   : > { %3939 = shalt.err (!%p3936_p4)
}
  0x69   : > { %3412 = dma.hbm_to_vmem [thread:$0]  (!%p4108_p12), %s4200_s25, 4096, %s255_s6, %s4123_s16, %s5495_s17, %s5495_s17, %s5494_s27  }
  0x6a   : > { %p5496_p1 = scmp.ne.s32.totalorder %s5492_s10, 0 }
  0x6c   : > { %282 = sbr.rel (%p5496_p1) target bundleno = 1471 (0x5bf), region = 40 }
  0x71   : > { %s4226_s0 = sand.u32 1, %s4000_s19   ;;  %p5497_p5 = scmp.ne.s32.totalorder %s5484_s28, 0 }
  0x72   : > { %s2993_s20 = sshll.u32 %s4226_s0, 8  ;;  %s285_s23 = scalar_lea.sflag [#allocation3], %s4226_s0 }
  0x73   : > { %s4230_s1 = scalar_lea.vmem [#allocation2], %s2993_s20 }
  0x74   : > { %3983 = dma.done.wait (%p5497_p5), %s285_s23, 4096  }
  0x75   : > { %3985 = vsyncadd (%p5497_p5), %s285_s23, 4294963200  ;;  %s293_s9 = sand.u32 1, %s4068_s22   ;;  %s4237_s10 = scalar_lea.vmem [#allocation5], %s2993_s20 }
  0x76   : > { %s294_s16 = scalar_lea.sflag [#allocation6], %s293_s9 }
  0x77   : > { %3987 = dma.done.wait (%p5497_p5), %s294_s16, 8192  }
  0x78   : > { %3989 = vsyncadd (%p5497_p5), %s294_s16, 4294959104  ;;  %s4243_s27 = scalar_lea.vmem [#allocation7], %s2993_s20  ;;  %vm508_vm0 = vcmask 261120   ;;  %v4283_v17 = vld [vmem:[%s4237_s10 + $0x18] sm:$0xff]  ;;  %v4295_v23 = vld [vmem:[%s4237_s10 + $0x10] sm:$0xff]  ;;  %s2997_s28 = sshll.u32 %s4068_s22, 3 }
  0x79   : > { %v4246_v0 = vld [vmem:[%s4243_s27 + $0x18] sm:$0xff]  ;;  %v4249_v1 = vld [vmem:[%s4243_s27 + $0x8] sm:$0xff]  ;;  %v4252_v2 = vld [vmem:[%s4243_s27 + $0x10] sm:$0xff]  ;;  %v479_v21 = vmul.f32 %v4283_v17, %v4283_v17  ;;  %v478_v27 = vmul.f32 %v4295_v23, %v4295_v23  ;;  %p355_p12 = scmp.lt.s32.totalorder %s2997_s28, 23  ;;  %s4015_s17 = smov 96   ;;  %vm2757_vm1 = vcmask 7168  }
  0x7a   : > { %v672_v3 = vmul.f32 %v4246_v0, %v4246_v0  ;;  %v670_v4 = vmul.f32 %v4249_v1, %v4249_v1  ;;  %v671_v5 = vmul.f32 %v4252_v2, %v4252_v2  ;;  %v4261_v6 = vld [vmem:[%s4243_s27 + $0x38] sm:$0xff]  ;;  %v4266_v8 = vld [vmem:[%s4243_s27 + $0x30] sm:$0xff]  ;;  %v4269_v9 = vld [vmem:[%s4243_s27] sm:$0xff]  ;;  %s2996_s7 = sshll.u32 %s4226_s0, 3  ;;  %s3112_s15 = sshll.u32 %s4068_s22, 7 }
  0x7b   : > { %v676_v7 = vmul.f32 %v4261_v6, %v4261_v6  ;;  %v675_v14 = vmul.f32 %v4266_v8, %v4266_v8  ;;  %v669_v15 = vmul.f32 %v4269_v9, %v4269_v9  ;;  %v4280_v16 = vld [vmem:[%s4243_s27 + $0x28] sm:$0xff]  ;;  %v4292_v22 = vld [vmem:[%s4243_s27 + $0x20] sm:$0xff]  ;;  %v518_v25 = vsel %vm508_vm0, %v479_v21, 0.0  ;;  %v4304_v28 = vld [vmem:[%s4237_s10 + $0x38] sm:$0xff]  ;;  %s5520_s28 = smov (!%p355_p12, %s2997_s28), 23  ;;  %s350_s8 = scalar_lea.vmem [#allocation8], %s2996_s7 }
  0x7c   : > { %v710_v10 = vsel %vm508_vm0, %v672_v3, 0.0  ;;  %v704_v11 = vsel %vm508_vm0, %v670_v4, 0.0  ;;  %v707_v12 = vsel %vm508_vm0, %v671_v5, 0.0  ;;  %v674_v20 = vmul.f32 %v4280_v16, %v4280_v16  ;;  %v4307_v29 = vld [vmem:[%s4237_s10 + $0x8] sm:$0xff]  ;;  %v4316_v34 = vld [vmem:[%s4237_s10 + $0x30] sm:$0xff]  ;;  %v4319_v35 = vld [vmem:[%s4237_s10] sm:$0xff]  ;;  %s5021_s12 = scalar_lea.vmem %s5462_s3, %s5520_s28  ;;  %s5348_s13 = scalar_lea.vmem %s5463_s4, %s5520_s28 }
  0x7d   : > { %711 = vadd.xlane.f32.xlu0 %v710_v10  ;;  %705 = vadd.xlane.f32.xlu1 %v704_v11  ;;  %v722_v13 = vsel %vm508_vm0, %v676_v7, 0.0  ;;  %v719_v18 = vsel %vm508_vm0, %v675_v14, 0.0  ;;  %v701_v19 = vsel %vm508_vm0, %v669_v15, 0.0  ;;  %v673_v26 = vmul.f32 %v4292_v22, %v4292_v22  ;;  %v4328_v40 = vld [vmem:[%s4237_s10 + $0x28] sm:$0xff]  ;;  %v4331_v41 = vld [vmem:[%s4243_s27 + $0x58] sm:$0xff]  ;;  %v4340_v46 = vld [vmem:[%s4237_s10 + $0x20] sm:$0xff]  ;;  %s2844_s9 = scalar_lea.hbm %s5464_s5, %s3112_s15 }
  0x7e   : > { %v716_v24 = vsel %vm508_vm0, %v674_v20, 0.0  ;;  %v515_v31 = vsel %vm508_vm0, %v478_v27, 0.0  ;;  %v483_v32 = vmul.f32 %v4304_v28, %v4304_v28  ;;  %v477_v33 = vmul.f32 %v4307_v29, %v4307_v29  ;;  %v4343_v47 = vld [vmem:[%s4243_s27 + $0x50] sm:$0xff]  ;;  %v4352_v52 = vld [vmem:[%s4243_s27 + $0x78] sm:$0xff]  ;;  %v4355_v53 = vld [vmem:[%s4243_s27 + $0x48] sm:$0xff]  ;;  %s2846_s11 = sshll.u32 %s350_s8, 4  ;;  %s5420_s11 = int_to_ptr.vmem [resolvable:$true] %s2846_s11 }
  0x7f   : > { %v713_v30 = vsel %vm508_vm0, %v673_v26, 0.0  ;;  %v482_v38 = vmul.f32 %v4316_v34, %v4316_v34  ;;  %v476_v39 = vmul.f32 %v4319_v35, %v4319_v35  ;;  %v481_v44 = vmul.f32 %v4328_v40, %v4328_v40  ;;  %v4364_v58 = vld [vmem:[%s4243_s27 + $0x70] sm:$0xff]  ;;  %v4367_v59 = vld [vmem:[%s4243_s27 + $0x40] sm:$0xff]  ;;  %v4376_v3 = vld [vmem:[%s4243_s27 + $0x68] sm:$0xff]  ;;  %s2833_s16 = scalar_lea.sflag [#allocation4], %s4226_s0  ;;  %p5512_p8 = scmp.ne.s32.totalorder %s5485_s29, 0 }
  0x80   : > { %v530_v36 = vsel %vm508_vm0, %v483_v32, 0.0  ;;  %v512_v37 = vsel %vm508_vm0, %v477_v33, 0.0  ;;  %v680_v45 = vmul.f32 %v4331_v41, %v4331_v41  ;;  %v480_v49 = vmul.f32 %v4340_v46, %v4340_v46  ;;  %v4379_v4 = vld [vmem:[%s4237_s10 + $0x58] sm:$0xff]  ;;  %v4403_v21 = vld [vmem:[%s4237_s10 + $0x48] sm:$0xff] }
  0x81   : > { %708 = vadd.xlane.f32.xlu0 %v707_v12  ;;  %723 = vadd.xlane.f32.xlu1 %v722_v13  ;;  %v527_v42 = vsel %vm508_vm0, %v482_v38, 0.0  ;;  %v509_v43 = vsel %vm508_vm0, %v476_v39, 0.0  ;;  %v524_v48 = vsel %vm508_vm0, %v481_v44, 0.0  ;;  %v679_v51 = vmul.f32 %v4343_v47, %v4343_v47  ;;  %v4388_v12 = vld [vmem:[%s4243_s27 + $0x60] sm:$0xff]  ;;  %v4391_v13 = vld [vmem:[%s4237_s10 + $0x50] sm:$0xff]  ;;  %v4400_v20 = vld [vmem:[%s4237_s10 + $0x78] sm:$0xff] }
  0x82   : > { %v734_v50 = vsel %vm508_vm0, %v680_v45, 0.0  ;;  %v521_v54 = vsel %vm508_vm0, %v480_v49, 0.0  ;;  %v684_v56 = vmul.f32 %v4352_v52, %v4352_v52  ;;  %v678_v57 = vmul.f32 %v4355_v53, %v4355_v53  ;;  %v4424_v38 = vld [vmem:[%s4243_s27 + $0x98] sm:$0xff]  ;;  %v4427_v39 = vld [vmem:[%s4237_s10 + $0x68] sm:$0xff]  ;;  %v4439_v49 = vld [vmem:[%s4237_s10 + $0x60] sm:$0xff] }
  0x83   : > { %v731_v55 = vsel %vm508_vm0, %v679_v51, 0.0  ;;  %v683_v62 = vmul.f32 %v4364_v58, %v4364_v58  ;;  %v677_v63 = vmul.f32 %v4367_v59, %v4367_v59  ;;  %v682_v10 = vmul.f32 %v4376_v3, %v4376_v3 }
  0x84   : > { %v746_v60 = vsel %vm508_vm0, %v684_v56, 0.0  ;;  %v728_v61 = vsel %vm508_vm0, %v678_v57, 0.0  ;;  %v487_v11 = vmul.f32 %v4379_v4, %v4379_v4  ;;  %v491_v26 = vmul.f32 %v4400_v20, %v4400_v20  ;;  %v4453_v57 = vld [vmem:[%s4243_s27 + $0xb8] sm:$0xff] }
  0x85   : > { %720 = vadd.xlane.f32.xlu1 %v719_v18  ;;  %702 = vadd.xlane.f32.xlu0 %v701_v19  ;;  %v743_v5 = vsel %vm508_vm0, %v683_v62, 0.0  ;;  %v725_v7 = vsel %vm508_vm0, %v677_v63, 0.0  ;;  %v740_v14 = vsel %vm508_vm0, %v682_v10, 0.0  ;;  %v681_v18 = vmul.f32 %v4388_v12, %v4388_v12  ;;  %v4470_v10 = vld [vmem:[%s4243_s27 + $0xb0] sm:$0xff] }
  0x86   : > { %v542_v15 = vsel %vm508_vm0, %v487_v11, 0.0  ;;  %v486_v19 = vmul.f32 %v4391_v13, %v4391_v13  ;;  %v485_v27 = vmul.f32 %v4403_v21, %v4403_v21  ;;  %v554_v32 = vsel %vm508_vm0, %v491_v26, 0.0  ;;  %v4473_v11 = vld [vmem:[%s4243_s27 + $0x80] sm:$0xff] }
  0x87   : > { %v688_v44 = vmul.f32 %v4424_v38, %v4424_v38  ;;  %v489_v45 = vmul.f32 %v4427_v39, %v4427_v39  ;;  %v488_v56 = vmul.f32 %v4439_v49, %v4439_v49 }
  0x88   : > { %v536_v33 = vsel %vm508_vm0, %v485_v27, 0.0 }
  0x89   : > { %717 = vadd.xlane.f32.xlu1 %v716_v24  ;;  %519 = vadd.xlane.f32.xlu0 %v518_v25  ;;  %v737_v24 = vsel %vm508_vm0, %v681_v18, 0.0  ;;  %v539_v25 = vsel %vm508_vm0, %v486_v19, 0.0  ;;  %v758_v51 = vsel %vm508_vm0, %v688_v44, 0.0  ;;  %v545_v63 = vsel %vm508_vm0, %v488_v56, 0.0 }
  0x8a   : > { %v691_v18 = vmul.f32 %v4470_v10, %v4470_v10  ;;  %v685_v19 = vmul.f32 %v4473_v11, %v4473_v11 }
  0x8c   : > { %v767_v26 = vsel %vm508_vm0, %v691_v18, 0.0  ;;  %v749_v27 = vsel %vm508_vm0, %v685_v19, 0.0 }
  0x8d   : > { %714 = vadd.xlane.f32.xlu1 %v713_v30  ;;  %516 = vadd.xlane.f32.xlu0 %v515_v31  ;;  %v4412_v30 = vld [vmem:[%s4237_s10 + $0x70] sm:$0xff]  ;;  %v4415_v31 = vld [vmem:[%s4237_s10 + $0x40] sm:$0xff] }
  0x91   : > { %531 = vadd.xlane.f32.xlu1 %v530_v36  ;;  %513 = vadd.xlane.f32.xlu0 %v512_v37  ;;  %v490_v36 = vmul.f32 %v4412_v30, %v4412_v30  ;;  %v484_v37 = vmul.f32 %v4415_v31, %v4415_v31 }
  0x95   : > { %528 = vadd.xlane.f32.xlu1 %v527_v42  ;;  %510 = vadd.xlane.f32.xlu0 %v509_v43  ;;  %v551_v42 = vsel %vm508_vm0, %v490_v36, 0.0  ;;  %v533_v43 = vsel %vm508_vm0, %v484_v37, 0.0  ;;  %v4494_v36 = vld [vmem:[%s4243_s27 + $0xa0] sm:$0xff]  ;;  %v4497_v37 = vld [vmem:[%s4237_s10 + $0x90] sm:$0xff] }
  0x96   : > { %5498 = vst [vmem:[#allocation14_spill] sm:$0xff] %v4497_v37  ;;  %v689_v44 = vmul.f32 %v4494_v36, %v4494_v36 }
  0x99   : > { %525 = vadd.xlane.f32.xlu0 %v524_v48  ;;  %735 = vadd.xlane.f32.xlu1 %v734_v50  ;;  %v4436_v48 = vld [vmem:[%s4243_s27 + $0x90] sm:$0xff]  ;;  %v4442_v50 = vld [vmem:[%s4230_s1] sm:$0xff] }
  0x9a   : > { %3233 = vmatprep.mubr.msk.f32.mxu0 %vm508_vm0, %v4442_v50 }
  0x9d   : > { %522 = vadd.xlane.f32.xlu0 %v521_v54  ;;  %732 = vadd.xlane.f32.xlu1 %v731_v55  ;;  %v548_v54 = vsel %vm508_vm0, %v489_v45, 0.0  ;;  %v687_v55 = vmul.f32 %v4436_v48, %v4436_v48  ;;  %v494_v45 = vmul.f32 %v4497_v37, %v4497_v37  ;;  %v4641_v37 = vld [vmem:[%s4230_s1 + $0x68] sm:$0xff] }
  0x9f   : > { %v755_v62 = vsel %vm508_vm0, %v687_v55, 0.0  ;;  %v761_v55 = vsel %vm508_vm0, %v689_v44, 0.0  ;;  %v563_v56 = vsel %vm508_vm0, %v494_v45, 0.0  ;;  %v454_v44 = vld [vmem:[%s4243_s27 + $0xd0] sm:$0xff]  ;;  %v416_v45 = vld [vmem:[%s4237_s10 + $0xa0] sm:$0xff] }
  0xa1   : > { %747 = vadd.xlane.f32.xlu1 %v746_v60  ;;  %729 = vadd.xlane.f32.xlu0 %v728_v61  ;;  %v4456_v60 = vld [vmem:[%s4243_s27 + $0x88] sm:$0xff]  ;;  %v4459_v61 = vld [vmem:[%s4230_s1 + $0x20] sm:$0xff] }
  0xa2   : > { %3255 = vmatprep.mubr.msk.f32.mxu1 %vm508_vm0, %v4459_v61 }
  0xa5   : > { %744 = vadd.xlane.f32.xlu1 %v743_v5  ;;  %726 = vadd.xlane.f32.xlu0 %v725_v7  ;;  %v692_v5 = vmul.f32 %v4453_v57, %v4453_v57  ;;  %v686_v7 = vmul.f32 %v4456_v60, %v4456_v60 }
  0xa9   : > { %741 = vadd.xlane.f32.xlu1 %v740_v14  ;;  %543 = vadd.xlane.f32.xlu0 %v542_v15  ;;  %v770_v14 = vsel %vm508_vm0, %v692_v5, 0.0  ;;  %v752_v15 = vsel %vm508_vm0, %v686_v7, 0.0  ;;  %v4518_v5 = vld [vmem:[%s4237_s10 + $0xb0] sm:$0xff]  ;;  %v4521_v7 = vld [vmem:[%s4237_s10 + $0x80] sm:$0xff] }
  0xaa   : > { %5501 = vst [vmem:[#allocation17_spill] sm:$0xff] %v4518_v5  ;;  %5502 = vst [vmem:[#allocation18_spill] sm:$0xff] %v4521_v7  ;;  %v498_v18 = vmul.f32 %v4518_v5, %v4518_v5  ;;  %v492_v19 = vmul.f32 %v4521_v7, %v4521_v7  ;;  %v425_v7 = vld [vmem:[%s4237_s10 + $0xe8] sm:$0xff] }
  0xad   : > { %738 = vadd.xlane.f32.xlu1 %v737_v24  ;;  %540 = vadd.xlane.f32.xlu0 %v539_v25  ;;  %v4482_v24 = vld [vmem:[%s4243_s27 + $0xa8] sm:$0xff]  ;;  %v4485_v25 = vld [vmem:[%s4237_s10 + $0x98] sm:$0xff] }
  0xb1   : > { %555 = vadd.xlane.f32.xlu1 %v554_v32  ;;  %537 = vadd.xlane.f32.xlu0 %v536_v33  ;;  %v690_v32 = vmul.f32 %v4482_v24, %v4482_v24  ;;  %v495_v33 = vmul.f32 %v4485_v25, %v4485_v25 }
  0xb5   : > { %552 = vadd.xlane.f32.xlu1 %v551_v42  ;;  %534 = vadd.xlane.f32.xlu0 %v533_v43  ;;  %v764_v42 = vsel %vm508_vm0, %v690_v32, 0.0  ;;  %v566_v43 = vsel %vm508_vm0, %v495_v33, 0.0  ;;  %v575_v32 = vsel %vm508_vm0, %v498_v18, 0.0  ;;  %v557_v33 = vsel %vm508_vm0, %v492_v19, 0.0 }
  0xb9   : > { %759 = vadd.xlane.f32.xlu1 %v758_v51  ;;  %549 = vadd.xlane.f32.xlu0 %v548_v54  ;;  %v4506_v51 = vld [vmem:[%s4237_s10 + $0xb8] sm:$0xff]  ;;  %v4509_v54 = vld [vmem:[%s4237_s10 + $0x88] sm:$0xff] }
  0xba   : > { %5499 = vst [vmem:[#allocation15_spill] sm:$0xff] %v4506_v51  ;;  %5500 = vst [vmem:[#allocation16_spill] sm:$0xff] %v4509_v54 }
  0xbd   : > { %756 = vadd.xlane.f32.xlu1 %v755_v62  ;;  %546 = vadd.xlane.f32.xlu0 %v545_v63  ;;  %v499_v62 = vmul.f32 %v4506_v51, %v4506_v51  ;;  %v493_v63 = vmul.f32 %v4509_v54, %v4509_v54  ;;  %v4638_v51 = vld [vmem:[%s4230_s1 + $0x60] sm:$0xff] }
  0xc1   : > { %771 = vadd.xlane.f32.xlu1 %v770_v14  ;;  %753 = vadd.xlane.f32.xlu0 %v752_v15  ;;  %v578_v14 = vsel %vm508_vm0, %v499_v62, 0.0  ;;  %v560_v15 = vsel %vm508_vm0, %v493_v63, 0.0  ;;  %v695_v62 = vmul.f32 %v454_v44, %v454_v44  ;;  %v496_v63 = vmul.f32 %v416_v45, %v416_v45 }
  0xc3   : > { %v779_v18 = vsel %vm508_vm0, %v695_v62, 0.0  ;;  %v569_v19 = vsel %vm508_vm0, %v496_v63, 0.0 }
  0xc5   : > { %768 = vadd.xlane.f32.xlu1 %v767_v26  ;;  %750 = vadd.xlane.f32.xlu0 %v749_v27  ;;  %v455_v26 = vld [vmem:[%s4243_s27 + $0xd8] sm:$0xff]  ;;  %v417_v27 = vld [vmem:[%s4237_s10 + $0xa8] sm:$0xff] }
  0xc9   : > { %765 = vadd.xlane.f32.xlu1 %v764_v42  ;;  %567 = vadd.xlane.f32.xlu0 %v566_v43  ;;  %v696_v42 = vmul.f32 %v455_v26, %v455_v26  ;;  %v497_v43 = vmul.f32 %v417_v27, %v417_v27 }
  0xcd   : > { %762 = vadd.xlane.f32.xlu1 %v761_v55  ;;  %564 = vadd.xlane.f32.xlu0 %v563_v56  ;;  %v782_v55 = vsel %vm508_vm0, %v696_v42, 0.0  ;;  %v572_v56 = vsel %vm508_vm0, %v497_v43, 0.0 }
  0xd1   : > { %579 = vadd.xlane.f32.xlu1 %v578_v14  ;;  %561 = vadd.xlane.f32.xlu0 %v560_v15  ;;  %v459_v14 = vld [vmem:[%s4243_s27 + $0xf8] sm:$0xff]  ;;  %v453_v15 = vld [vmem:[%s4243_s27 + $0xc8] sm:$0xff] }
  0xd2   : > { %v700_v26 = vmul.f32 %v459_v14, %v459_v14  ;;  %v694_v27 = vmul.f32 %v453_v15, %v453_v15 }
  0xd4   : > { %v794_v42 = vsel %vm508_vm0, %v700_v26, 0.0  ;;  %v776_v43 = vsel %vm508_vm0, %v694_v27, 0.0 }
  0xd5   : > { %576 = vadd.xlane.f32.xlu1 %v575_v32  ;;  %558 = vadd.xlane.f32.xlu0 %v557_v33  ;;  %v458_v32 = vld [vmem:[%s4243_s27 + $0xf0] sm:$0xff]  ;;  %v452_v33 = vld [vmem:[%s4243_s27 + $0xc0] sm:$0xff] }
  0xd6   : > { %v699_v44 = vmul.f32 %v458_v32, %v458_v32  ;;  %v693_v45 = vmul.f32 %v452_v33, %v452_v33 }
  0xd8   : > { %v791_v62 = vsel %vm508_vm0, %v699_v44, 0.0  ;;  %v773_v63 = vsel %vm508_vm0, %v693_v45, 0.0 }
  0xd9   : > { %783 = vadd.xlane.f32.xlu1 %v782_v55  ;;  %573 = vadd.xlane.f32.xlu0 %v572_v56  ;;  %v457_v55 = vld [vmem:[%s4243_s27 + $0xe8] sm:$0xff]  ;;  %v423_v56 = vld [vmem:[%s4237_s10 + $0xd8] sm:$0xff] }
  0xda   : > { %v698_v14 = vmul.f32 %v457_v55, %v457_v55  ;;  %v503_v15 = vmul.f32 %v423_v56, %v423_v56 }
  0xdc   : > { %v788_v26 = vsel %vm508_vm0, %v698_v14, 0.0  ;;  %v590_v27 = vsel %vm508_vm0, %v503_v15, 0.0 }
  0xdd   : > { %780 = vadd.xlane.f32.xlu1 %v779_v18  ;;  %570 = vadd.xlane.f32.xlu0 %v569_v19  ;;  %v456_v18 = vld [vmem:[%s4243_s27 + $0xe0] sm:$0xff]  ;;  %v422_v19 = vld [vmem:[%s4237_s10 + $0xd0] sm:$0xff] }
  0xde   : > { %v697_v32 = vmul.f32 %v456_v18, %v456_v18  ;;  %v502_v33 = vmul.f32 %v422_v19, %v422_v19 }
  0xe0   : > { %v785_v44 = vsel %vm508_vm0, %v697_v32, 0.0  ;;  %v587_v45 = vsel %vm508_vm0, %v502_v33, 0.0  ;;  %v505_v33 = vmul.f32 %v425_v7, %v425_v7  ;;  %v4575_v7 = vld [vmem:[%s4230_s1 + $0x10] sm:$0xff] }
  0xe1   : > { %795 = vadd.xlane.f32.xlu1 %v794_v42  ;;  %777 = vadd.xlane.f32.xlu0 %v776_v43  ;;  %v427_v42 = vld [vmem:[%s4237_s10 + $0xf8] sm:$0xff]  ;;  %v421_v43 = vld [vmem:[%s4237_s10 + $0xc8] sm:$0xff] }
  0xe2   : > { %v507_v55 = vmul.f32 %v427_v42, %v427_v42  ;;  %v501_v56 = vmul.f32 %v421_v43, %v421_v43  ;;  %v4566_v43 = vld [vmem:[%s4230_s1 + $0x8] sm:$0xff] }
  0xe4   : > { %v602_v14 = vsel %vm508_vm0, %v507_v55, 0.0  ;;  %v584_v15 = vsel %vm508_vm0, %v501_v56, 0.0  ;;  %v861_v55 = vmul.f32 %v4442_v50, %v4442_v50  ;;  %v862_v56 = vmul.f32 %v4566_v43, %v4566_v43 }
  0xe5   : > { %792 = vadd.xlane.f32.xlu1 %v791_v62  ;;  %774 = vadd.xlane.f32.xlu0 %v773_v63  ;;  %v426_v62 = vld [vmem:[%s4237_s10 + $0xf0] sm:$0xff]  ;;  %v420_v63 = vld [vmem:[%s4237_s10 + $0xc0] sm:$0xff]  ;;  %v863_v50 = vmul.f32 %v4575_v7, %v4575_v7 }
  0xe6   : > { %v506_v18 = vmul.f32 %v426_v62, %v426_v62  ;;  %v500_v19 = vmul.f32 %v420_v63, %v420_v63  ;;  %v4578_v62 = vld [vmem:[%s4230_s1 + $0x18] sm:$0xff]  ;;  %v896_v63 = vsel %vm508_vm0, %v862_v56, 0.0 }
  0xe8   : > { %v581_v32 = vsel %vm508_vm0, %v500_v19, 0.0  ;;  %v865_v19 = vmul.f32 %v4459_v61, %v4459_v61 }
  0xe9   : > { %789 = vadd.xlane.f32.xlu1 %v788_v26  ;;  %591 = vadd.xlane.f32.xlu0 %v590_v27  ;;  %v424_v26 = vld [vmem:[%s4237_s10 + $0xe0] sm:$0xff]  ;;  %v599_v27 = vsel %vm508_vm0, %v506_v18, 0.0  ;;  %v4587_v18 = vld [vmem:[%s4230_s1 + $0x28] sm:$0xff] }
  0xea   : > { %v504_v42 = vmul.f32 %v424_v26, %v424_v26 }
  0xed   : > { %786 = vadd.xlane.f32.xlu1 %v785_v44  ;;  %588 = vadd.xlane.f32.xlu0 %v587_v45  ;;  %v596_v44 = vsel %vm508_vm0, %v505_v33, 0.0  ;;  %v593_v45 = vsel %vm508_vm0, %v504_v42, 0.0  ;;  %v4596_v33 = vld [vmem:[%s4230_s1 + $0x30] sm:$0xff]  ;;  %v4599_v42 = vld [vmem:[%s4230_s1 + $0x38] sm:$0xff] }
  0xee   : > { %v867_v61 = vmul.f32 %v4596_v33, %v4596_v33 }
  0xf1   : > { %603 = vadd.xlane.f32.xlu1 %v602_v14  ;;  %585 = vadd.xlane.f32.xlu0 %v584_v15  ;;  %v893_v14 = vsel %vm508_vm0, %v861_v55, 0.0  ;;  %v864_v15 = vmul.f32 %v4578_v62, %v4578_v62  ;;  %v868_v55 = vmul.f32 %v4599_v42, %v4599_v42 }
  0xf3   : > { %v902_v26 = vsel %vm508_vm0, %v864_v15, 0.0  ;;  %v914_v15 = vsel %vm508_vm0, %v868_v55, 0.0  ;;  %v4615_v55 = vld [vmem:[%s4230_s1 + $0x40] sm:$0xff] }
  0xf5   : > { %600 = vadd.xlane.f32.xlu1 %v599_v27  ;;  %582 = vadd.xlane.f32.xlu0 %v581_v32  ;;  %v899_v27 = vsel %vm508_vm0, %v863_v50, 0.0  ;;  %v866_v32 = vmul.f32 %v4587_v18, %v4587_v18 }
  0xf9   : > { %597 = vadd.xlane.f32.xlu0 %v596_v44  ;;  %594 = vadd.xlane.f32.xlu1 %v593_v45  ;;  %v908_v44 = vsel %vm508_vm0, %v866_v32, 0.0  ;;  %v905_v45 = vsel %vm508_vm0, %v865_v19, 0.0  ;;  %v4610_v32 = vld [vmem:[%s4230_s1 + $0x48] sm:$0xff] }
  0xfd   : > { %897 = vadd.xlane.f32.xlu1 %v896_v63  ;;  %894 = vadd.xlane.f32.xlu0 %v893_v14  ;;  %v911_v14 = vsel %vm508_vm0, %v867_v61, 0.0  ;;  %v870_v61 = vmul.f32 %v4610_v32, %v4610_v32 }
 0x101   : > { %903 = vadd.xlane.f32.xlu1 %v902_v26  ;;  %900 = vadd.xlane.f32.xlu0 %v899_v27 }
 0x105   : > { %909 = vadd.xlane.f32.xlu1 %v908_v44  ;;  %906 = vadd.xlane.f32.xlu0 %v905_v45 }
 0x106   : > { %v712_v56 = vpop.xlane.xlu0 %711  ;;  %v706_v63 = vpop.xlane.xlu1 %705 }
 0x107   : > { %3454 = vrsqrt.f32 %v712_v56 }
 0x108   : > { %3456 = vrsqrt.f32 %v706_v63  ;;  %v920_v63 = vsel %vm508_vm0, %v870_v61, 0.0 }
 0x109   : > { %912 = vadd.xlane.f32.xlu0 %v911_v14  ;;  %915 = vadd.xlane.f32.xlu1 %v914_v15  ;;  %v869_v14 = vmul.f32 %v4615_v55, %v4615_v55 }
 0x10a   : > { %v709_v50 = vpop.xlane.xlu0 %708  ;;  %v724_v19 = vpop.xlane.xlu1 %723 }
 0x10b   : > { %3458 = vrsqrt.f32 %v709_v50 }
 0x10c   : > { %3460 = vrsqrt.f32 %v724_v19 }
 0x10d   : > { %921 = vadd.xlane.f32.xlu1 %v920_v63 }
 0x10e   : > { %v721_v26 = vpop.xlane.xlu1 %720  ;;  %v703_v27 = vpop.xlane.xlu0 %702 }
 0x10f   : > { %3462 = vrsqrt.f32 %v721_v26  ;;  %v4622_v26 = vld [vmem:[%s4230_s1 + $0x58] sm:$0xff] }
 0x110   : > { %3464 = vrsqrt.f32 %v703_v27  ;;  %v917_v27 = vsel %vm508_vm0, %v869_v14, 0.0 }
 0x111   : > { %918 = vadd.xlane.f32.xlu0 %v917_v27 }
 0x112   : > { %v718_v44 = vpop.xlane.xlu1 %717  ;;  %v520_v45 = vpop.xlane.xlu0 %519 }
 0x113   : > { %3466 = vrsqrt.f32 %v718_v44  ;;  %v4627_v44 = vld [vmem:[%s4230_s1 + $0x50] sm:$0xff] }
 0x114   : > { %v3455_v56 = vpop.eup %3454  ;;  %3468 = vrsqrt.f32 %v520_v45  ;;  %v872_v45 = vmul.f32 %v4622_v26, %v4622_v26  ;;  %v871_v61 = vmul.f32 %v4627_v44, %v4627_v44 }
 0x115   : > { %v832_v15 = vmul.f32 %v3455_v56, %v4246_v0  ;;  %v3457_v5 = vpop.eup %3456 }
 0x116   : > { %v715_v50 = vpop.xlane.xlu1 %714  ;;  %v517_v19 = vpop.xlane.xlu0 %516  ;;  %v926_v14 = vsel %vm508_vm0, %v872_v45, 0.0 }
 0x117   : > { %3470 = vrsqrt.f32 %v715_v50  ;;  %3217 = vmatprep.subr.msk.mxu0 %vm508_vm0, %v832_v15  ;;  %927 = vadd.xlane.f32.xlu1 %v926_v14 }
 0x118   : > { %v3459_v0 = vpop.eup %3458  ;;  %3472 = vrsqrt.f32 %v517_v19  ;;  %3218 = vmatpush3.xpose.msk.msra.mxu0 %vm508_vm0, %v832_v15  ;;  %v923_v15 = vsel %vm508_vm0, %v871_v61, 0.0  ;;  %v874_v19 = vmul.f32 %v4641_v37, %v4641_v37 }
 0x119   : > { %v3461_v56 = vpop.eup %3460  ;;  %v831_v63 = vmul.f32 %v3459_v0, %v4252_v2  ;;  %v830_v2 = vmul.f32 %v3457_v5, %v4249_v1  ;;  %924 = vadd.xlane.f32.xlu0 %v923_v15  ;;  %v4653_v0 = vld [vmem:[%s4230_s1 + $0x78] sm:$0xff]  ;;  %v4659_v5 = vld [vmem:[%s4230_s1 + $0x70] sm:$0xff] }
 0x11a   : > { %v532_v50 = vpop.xlane.xlu1 %531  ;;  %v514_v54 = vpop.xlane.xlu0 %513  ;;  %v836_v27 = vmul.f32 %v3461_v56, %v4261_v6  ;;  %v873_v6 = vmul.f32 %v4638_v51, %v4638_v51  ;;  %v932_v56 = vsel %vm508_vm0, %v874_v19, 0.0 }
 0x11b   : > { %3474 = vrsqrt.f32 %v532_v50  ;;  %3219 = vmatprep.subr.msk.mxu0 %vm508_vm0, %v831_v63  ;;  %933 = vadd.xlane.f32.xlu1 %v932_v56 }
 0x11c   : > { %v3463_v45 = vpop.eup %3462  ;;  %3476 = vrsqrt.f32 %v514_v54  ;;  %3239 = vmatprep.subr.msk.mxu1 %vm508_vm0, %v836_v27  ;;  %3220 = vmatpush3.xpose.msk.msra.mxu0 %vm508_vm0, %v831_v63  ;;  %v929_v54 = vsel %vm508_vm0, %v873_v6, 0.0  ;;  %v876_v63 = vmul.f32 %v4653_v0, %v4653_v0  ;;  %v4672_v6 = vld [vmem:[%s4230_s1 + $0x80] sm:$0xff] }
 0x11d   : > { %v3465_v61 = vpop.eup %3464  ;;  %3240 = vmatpush3.xpose.msk.msra.mxu1 %vm508_vm0, %v836_v27  ;;  %3221 = vmatprep.subr.msk.mxu0 %vm508_vm0, %v830_v2  ;;  %v835_v1 = vmul.f32 %v3463_v45, %v4266_v8  ;;  %v875_v27 = vmul.f32 %v4659_v5, %v4659_v5  ;;  %v4675_v45 = vld [vmem:[%s4230_s1 + $0x88] sm:$0xff] }
 0x11e   : > { %v529_v14 = vpop.xlane.xlu1 %528  ;;  %v511_v50 = vpop.xlane.xlu0 %510  ;;  %v829_v8 = vmul.f32 %v3465_v61, %v4269_v9  ;;  %930 = vadd.xlane.f32.xlu0 %v929_v54  ;;  %v938_v15 = vsel %vm508_vm0, %v876_v63, 0.0  ;;  %5503 = vst [vmem:[#allocation19_spill] sm:$0xff] %v4675_v45  ;;  %v878_v61 = vmul.f32 %v4675_v45, %v4675_v45 }
 0x11f   : > { %3478 = vrsqrt.f32 %v529_v14  ;;  %3241 = vmatprep.subr.msk.mxu1 %vm508_vm0, %v835_v1  ;;  %v935_v56 = vsel %vm508_vm0, %v875_v27, 0.0  ;;  %939 = vadd.xlane.f32.xlu1 %v938_v15  ;;  %v4691_v27 = vld [vmem:[%s4230_s1 + $0x90] sm:$0xff] }
 0x120   : > { %v3467_v19 = vpop.eup %3466  ;;  %3480 = vrsqrt.f32 %v511_v50  ;;  %3222 = vmatpush3.xpose.msk.msra.mxu0 %vm508_vm0, %v830_v2  ;;  %v877_v2 = vmul.f32 %v4672_v6, %v4672_v6  ;;  %v4686_v50 = vld [vmem:[%s4230_s1 + $0x98] sm:$0xff] }
 0x121   : > { %v3469_v14 = vpop.eup %3468  ;;  %3242 = vmatpush3.xpose.msk.msra.mxu1 %vm508_vm0, %v835_v1  ;;  %3223 = vmatprep.subr.msk.mxu0 %vm508_vm0, %v829_v8  ;;  %v834_v9 = vmul.f32 %v3467_v19, %v4280_v16  ;;  %5504 = vst [vmem:[#allocation20_spill] sm:$0xff] %v4686_v50  ;;  %v944_v16 = vsel %vm508_vm0, %v878_v61, 0.0  ;;  %v880_v19 = vmul.f32 %v4686_v50, %v4686_v50  ;;  %v4704_v50 = vld [vmem:[%s4230_s1 + $0xa8] sm:$0xff] }
 0x122   : > { %v526_v54 = vpop.xlane.xlu0 %525  ;;  %v736_v63 = vpop.xlane.xlu1 %735  ;;  %v640_v1 = vmul.f32 %v3469_v14, %v4283_v17  ;;  %936 = vadd.xlane.f32.xlu0 %v935_v56  ;;  %v941_v15 = vsel %vm508_vm0, %v877_v2, 0.0  ;;  %v4709_v2 = vld [vmem:[%s4230_s1 + $0xa0] sm:$0xff] }
 0x123   : > { %3482 = vrsqrt.f32 %v526_v54  ;;  %3243 = vmatprep.subr.msk.mxu1 %vm508_vm0, %v834_v9  ;;  %v879_v54 = vmul.f32 %v4691_v27, %v4691_v27  ;;  %945 = vadd.xlane.f32.xlu1 %v944_v16  ;;  %v881_v16 = vmul.f32 %v4709_v2, %v4709_v2 }
 0x124   : > { %v3471_v45 = vpop.eup %3470  ;;  %3224 = vmatpush3.xpose.msk.msra.mxu0 %vm508_vm0, %v829_v8  ;;  %3484 = vrsqrt.f32 %v736_v63  ;;  %v882_v63 = vmul.f32 %v4704_v50, %v4704_v50 }
 0x125   : > { %v3473_v17 = vpop.eup %3472  ;;  %3244 = vmatpush3.xpose.msk.msra.mxu1 %vm508_vm0, %v834_v9  ;;  %3225 = vmatprep.subr.msk.mxu0 %vm508_vm0, %v640_v1  ;;  %v833_v56 = vmul.f32 %v3471_v45, %v4292_v22  ;;  %v950_v9 = vsel %vm508_vm0, %v880_v19, 0.0  ;;  %v947_v45 = vsel %vm508_vm0, %v879_v54, 0.0  ;;  %v4727_v54 = vld [vmem:[%s4230_s1 + $0xb0] sm:$0xff] }
 0x126   : > { %v523_v14 = vpop.xlane.xlu0 %522  ;;  %v733_v61 = vpop.xlane.xlu1 %732  ;;  %v639_v8 = vmul.f32 %v3473_v17, %v4295_v23  ;;  %942 = vadd.xlane.f32.xlu0 %v941_v15 }
 0x127   : > { %3486 = vrsqrt.f32 %v523_v14  ;;  %3245 = vmatprep.subr.msk.mxu1 %vm508_vm0, %v833_v56  ;;  %v4722_v14 = vld [vmem:[%s4230_s1 + $0xb8] sm:$0xff]  ;;  %951 = vadd.xlane.f32.xlu1 %v950_v9  ;;  %v953_v9 = vsel %vm508_vm0, %v881_v16, 0.0 }
 0x128   : > { %v3475_v22 = vpop.eup %3474  ;;  %3226 = vmatpush3.xpose.msk.msra.mxu0 %vm508_vm0, %v640_v1  ;;  %3488 = vrsqrt.f32 %v733_v61  ;;  %v884_v61 = vmul.f32 %v4722_v14, %v4722_v14 }
 0x129   : > { %v3477_v23 = vpop.eup %3476  ;;  %3246 = vmatpush3.xpose.msk.msra.mxu1 %vm508_vm0, %v833_v56  ;;  %3227 = vmatprep.subr.msk.mxu0 %vm508_vm0, %v639_v8  ;;  %v644_v19 = vmul.f32 %v3475_v22, %v4304_v28  ;;  %v956_v56 = vsel %vm508_vm0, %v882_v63, 0.0  ;;  %v883_v22 = vmul.f32 %v4727_v54, %v4727_v54 }
 0x12a   : > { %v748_v15 = vpop.xlane.xlu1 %747  ;;  %v730_v17 = vpop.xlane.xlu0 %729  ;;  %v638_v1 = vmul.f32 %v3477_v23, %v4307_v29  ;;  %948 = vadd.xlane.f32.xlu0 %v947_v45  ;;  %v962_v16 = vsel %vm508_vm0, %v884_v61, 0.0 }
 0x12b   : > { %3247 = vmatprep.subr.msk.mxu1 %vm508_vm0, %v644_v19  ;;  %3490 = vrsqrt.f32 %v748_v15  ;;  %v4740_v15 = vld [vmem:[%s4230_s1 + $0xc8] sm:$0xff]  ;;  %957 = vadd.xlane.f32.xlu1 %v956_v56 }
 0x12c   : > { %v3479_v28 = vpop.eup %3478  ;;  %3228 = vmatpush3.xpose.msk.msra.mxu0 %vm508_vm0, %v639_v8  ;;  %3492 = vrsqrt.f32 %v730_v17 }
 0x12d   : > { %v3481_v29 = vpop.eup %3480  ;;  %3248 = vmatpush3.xpose.msk.msra.mxu1 %vm508_vm0, %v644_v19  ;;  %3229 = vmatprep.subr.msk.mxu0 %vm508_vm0, %v638_v1  ;;  %v643_v45 = vmul.f32 %v3479_v28, %v4316_v34  ;;  %v886_v19 = vmul.f32 %v4740_v15, %v4740_v15  ;;  %v959_v34 = vsel %vm508_vm0, %v883_v22, 0.0 }
 0x12e   : > { %v745_v63 = vpop.xlane.xlu1 %744  ;;  %v727_v23 = vpop.xlane.xlu0 %726  ;;  %v637_v8 = vmul.f32 %v3481_v29, %v4319_v35  ;;  %954 = vadd.xlane.f32.xlu0 %v953_v9  ;;  %v4754_v29 = vld [vmem:[%s4230_s1 + $0xc0] sm:$0xff] }
 0x12f   : > { %3249 = vmatprep.subr.msk.mxu1 %vm508_vm0, %v643_v45  ;;  %3494 = vrsqrt.f32 %v745_v63  ;;  %v4757_v63 = vld [vmem:[%s4230_s1 + $0xd8] sm:$0xff]  ;;  %963 = vadd.xlane.f32.xlu1 %v962_v16  ;;  %v885_v22 = vmul.f32 %v4754_v29, %v4754_v29 }
 0x130   : > { %v3483_v17 = vpop.eup %3482  ;;  %3230 = vmatpush3.xpose.msk.msra.mxu0 %vm508_vm0, %v638_v1  ;;  %3496 = vrsqrt.f32 %v727_v23  ;;  %v968_v1 = vsel %vm508_vm0, %v886_v19, 0.0 }
 0x131   : > { %v3485_v56 = vpop.eup %3484  ;;  %3250 = vmatpush3.xpose.msk.msra.mxu1 %vm508_vm0, %v643_v45  ;;  %3231 = vmatprep.subr.msk.mxu0 %vm508_vm0, %v637_v8  ;;  %v642_v35 = vmul.f32 %v3483_v17, %v4328_v40  ;;  %v888_v40 = vmul.f32 %v4757_v63, %v4757_v63 }
 0x132   : > { %v742_v28 = vpop.xlane.xlu1 %741  ;;  %v544_v9 = vpop.xlane.xlu0 %543  ;;  %v840_v61 = vmul.f32 %v3485_v56, %v4331_v41  ;;  %960 = vadd.xlane.f32.xlu0 %v959_v34  ;;  %v965_v34 = vsel %vm508_vm0, %v885_v22, 0.0  ;;  %v4788_v22 = vld [vmem:[%s4230_s1 + $0xe8] sm:$0xff] }
 0x133   : > { %3251 = vmatprep.subr.msk.mxu1 %vm508_vm0, %v642_v35  ;;  %3498 = vrsqrt.f32 %v742_v28  ;;  %969 = vadd.xlane.f32.xlu1 %v968_v1 }
 0x134   : > { %v3487_v45 = vpop.eup %3486  ;;  %3232 = vmatpush3.xpose.msk.msra.mxu0 %vm508_vm0, %v637_v8  ;;  %3500 = vrsqrt.f32 %v544_v9  ;;  %v4774_v8 = vld [vmem:[%s4230_s1 + $0xd0] sm:$0xff] }
 0x135   : > { %v3489_v41 = vpop.eup %3488  ;;  %3252 = vmatpush3.xpose.msk.msra.mxu1 %vm508_vm0, %v642_v35  ;;  %v641_v23 = vmul.f32 %v3487_v45, %v4340_v46  ;;  %3261 = vmatprep.subr.msk.mxu0 %vm508_vm0, %v840_v61  ;;  %v974_v46 = vsel %vm508_vm0, %v888_v40, 0.0 }
 0x136   : > { %v739_v16 = vpop.xlane.xlu1 %738  ;;  %v541_v19 = vpop.xlane.xlu0 %540  ;;  %v839_v17 = vmul.f32 %v3489_v41, %v4343_v47  ;;  %v887_v47 = vmul.f32 %v4774_v8, %v4774_v8  ;;  %966 = vadd.xlane.f32.xlu0 %v965_v34 }
 0x137   : > { %3234 = vmatmul.mubr.msk.f32.vlgmr.msra.gmra.mxu0 %vm508_vm0, %v4566_v43  ;;  %3253 = vmatprep.subr.msk.mxu1 %vm508_vm0, %v641_v23  ;;  %3502 = vrsqrt.f32 %v739_v16  ;;  %v4813_v16 = vld [vmem:[%s4230_s1 + $0xf8] sm:$0xff] }
 0x138   : > { %v3491_v56 = vpop.eup %3490  ;;  %3236 = vmatprep.mubr.msk.f32.mxu0 %vm508_vm0, %v4575_v7  ;;  %3262 = vmatpush3.xpose.msk.msra.mxu0 %vm508_vm0, %v840_v61  ;;  %3504 = vrsqrt.f32 %v541_v19  ;;  %v4794_v7 = vld [vmem:[%s4230_s1 + $0xe0] sm:$0xff]  ;;  %v890_v61 = vmul.f32 %v4788_v22, %v4788_v22  ;;  %v4817_v19 = vld [vmem:[%s4230_s1 + $0xf0] sm:$0xff] }
 0x139   : > { %v3493_v43 = vpop.eup %3492  ;;  %3254 = vmatpush3.xpose.msk.msra.mxu1 %vm508_vm0, %v641_v23  ;;  %3263 = vmatprep.subr.msk.mxu0 %vm508_vm0, %v839_v17  ;;  %v844_v35 = vmul.f32 %v3491_v56, %v4352_v52 }
 0x13a   : > { %v556_v28 = vpop.xlane.xlu1 %555  ;;  %v538_v9 = vpop.xlane.xlu0 %537  ;;  %v838_v1 = vmul.f32 %v3493_v43, %v4355_v53  ;;  %975 = vadd.xlane.f32.xlu1 %v974_v46  ;;  %v971_v53 = vsel %vm508_vm0, %v887_v47, 0.0 }
 0x13b   : > { %3237 = vmatmul.mubr.msk.f32.gmra.mxu0 %vm508_vm0, %v4578_v62  ;;  %3506 = vrsqrt.f32 %v556_v28  ;;  %3283 = vmatprep.subr.msk.mxu1 %vm508_vm0, %v844_v35  ;;  %v889_v62 = vmul.f32 %v4794_v7, %v4794_v7 }
 0x13c   : > { %v3495_v52 = vpop.eup %3494  ;;  %3256 = vmatmul.mubr.msk.f32.vlgmr.msra.gmra.mxu1 %vm508_vm0, %v4587_v18  ;;  %3264 = vmatpush3.xpose.msk.msra.mxu0 %vm508_vm0, %v839_v17  ;;  %3508 = vrsqrt.f32 %v538_v9 }
 0x13d   : > { %v3497_v40 = vpop.eup %3496  ;;  %3265 = vmatprep.subr.msk.mxu0 %vm508_vm0, %v838_v1  ;;  %3258 = vmatprep.mubr.msk.f32.mxu1 %vm508_vm0, %v4596_v33  ;;  %v843_v45 = vmul.f32 %v3495_v52, %v4364_v58  ;;  %v980_v33 = vsel %vm508_vm0, %v890_v61, 0.0  ;;  %v892_v58 = vmul.f32 %v4813_v16, %v4813_v16 }
 0x13e   : > { %3284 = vmatpush3.xpose.msk.msra.mxu1 %vm508_vm0, %v844_v35  ;;  %v553_v18 = vpop.xlane.xlu1 %552  ;;  %v535_v41 = vpop.xlane.xlu0 %534  ;;  %v837_v23 = vmul.f32 %v3497_v40, %v4367_v59  ;;  %3277 = vmatprep.mubr.msk.f32.mxu0 %vm508_vm0, %v4615_v55  ;;  %v977_v59 = vsel %vm508_vm0, %v889_v62, 0.0  ;;  %v891_v55 = vmul.f32 %v4817_v19, %v4817_v19 }
 0x13f   : > { %3510 = vrsqrt.f32 %v553_v18  ;;  %3285 = vmatprep.subr.msk.mxu1 %vm508_vm0, %v843_v45  ;;  %972 = vadd.xlane.f32.xlu0 %v971_v53  ;;  %v986_v43 = vsel %vm508_vm0, %v892_v58, 0.0 }
 0x140   : > { %v3499_v17 = vpop.eup %3498  ;;  %3266 = vmatpush3.xpose.msk.msra.mxu0 %vm508_vm0, %v838_v1  ;;  %3259 = vmatmul.mubr.msk.f32.gmra.mxu1 %vm508_vm0, %v4599_v42  ;;  %3512 = vrsqrt.f32 %v535_v41 }
 0x141   : > { %v3501_v34 = vpop.eup %3500  ;;  %3267 = vmatprep.subr.msk.mxu0 %vm508_vm0, %v837_v23  ;;  %v842_v46 = vmul.f32 %v3499_v17, %v4376_v3  ;;  %3299 = vmatprep.mubr.msk.f32.mxu1 %vm508_vm0, %v4638_v51  ;;  %v983_v3 = vsel %vm508_vm0, %v891_v55, 0.0 }
 0x142   : > { %3286 = vmatpush3.xpose.msk.msra.mxu1 %vm508_vm0, %v843_v45  ;;  %v760_v56 = vpop.xlane.xlu1 %759  ;;  %v550_v47 = vpop.xlane.xlu0 %549  ;;  %v648_v42 = vmul.f32 %v3501_v34, %v4379_v4  ;;  %981 = vadd.xlane.f32.xlu1 %v980_v33 }
 0x143   : > { %3514 = vrsqrt.f32 %v760_v56  ;;  %3287 = vmatprep.subr.msk.mxu1 %vm508_vm0, %v842_v46  ;;  %978 = vadd.xlane.f32.xlu0 %v977_v59 }
 0x144   : > { %v3503_v35 = vpop.eup %3502  ;;  %3268 = vmatpush3.xpose.msk.msra.mxu0 %vm508_vm0, %v837_v23  ;;  %3516 = vrsqrt.f32 %v550_v47 }
 0x145   : > { %v3505_v51 = vpop.eup %3504  ;;  %3269 = vmatprep.subr.msk.mxu0 %vm508_vm0, %v648_v42  ;;  %v841_v28 = vmul.f32 %v3503_v35, %v4388_v12 }
 0x146   : > { %3288 = vmatpush3.xpose.msk.msra.mxu1 %vm508_vm0, %v842_v46  ;;  %v757_v4 = vpop.xlane.xlu1 %756  ;;  %v547_v9 = vpop.xlane.xlu0 %546  ;;  %v647_v1 = vmul.f32 %v3505_v51, %v4391_v13  ;;  %987 = vadd.xlane.f32.xlu1 %v986_v43 }
 0x147   : > { %3518 = vrsqrt.f32 %v757_v4  ;;  %3289 = vmatprep.subr.msk.mxu1 %vm508_vm0, %v841_v28  ;;  %984 = vadd.xlane.f32.xlu0 %v983_v3 }
 0x148   : > { %v3507_v61 = vpop.eup %3506  ;;  %3270 = vmatpush3.xpose.msk.msra.mxu0 %vm508_vm0, %v648_v42  ;;  %3520 = vrsqrt.f32 %v547_v9 }
 0x149   : > { %v3509_v52 = vpop.eup %3508  ;;  %3271 = vmatprep.subr.msk.mxu0 %vm508_vm0, %v647_v1  ;;  %v652_v12 = vmul.f32 %v3507_v61, %v4400_v20  ;;  %v5506_v61 = vld [vmem:[#allocation15_spill] sm:$0xff] }
 0x14a   : > { %3290 = vmatpush3.xpose.msk.msra.mxu1 %vm508_vm0, %v841_v28  ;;  %v772_v53 = vpop.xlane.xlu1 %771  ;;  %v754_v62 = vpop.xlane.xlu0 %753  ;;  %v646_v13 = vmul.f32 %v3509_v52, %v4403_v21 }
 0x14b   : > { %3522 = vrsqrt.f32 %v772_v53  ;;  %3291 = vmatprep.subr.msk.mxu1 %vm508_vm0, %v652_v12  ;;  %v5507_v53 = vld [vmem:[#allocation16_spill] sm:$0xff] }
 0x14c   : > { %v3511_v40 = vpop.eup %3510  ;;  %3272 = vmatpush3.xpose.msk.msra.mxu0 %vm508_vm0, %v647_v1  ;;  %3524 = vrsqrt.f32 %v754_v62 }
 0x14d   : > { %v3513_v45 = vpop.eup %3512  ;;  %3273 = vmatprep.subr.msk.mxu0 %vm508_vm0, %v646_v13  ;;  %v651_v18 = vmul.f32 %v3511_v40, %v4412_v30 }
 0x14e   : > { %3292 = vmatpush3.xpose.msk.msra.mxu1 %vm508_vm0, %v652_v12  ;;  %v769_v20 = vpop.xlane.xlu1 %768  ;;  %v751_v41 = vpop.xlane.xlu0 %750  ;;  %v645_v23 = vmul.f32 %v3513_v45, %v4415_v31  ;;  %v5508_v45 = vld [vmem:[#allocation17_spill] sm:$0xff] }
 0x14f   : > { %3526 = vrsqrt.f32 %v769_v20  ;;  %3293 = vmatprep.subr.msk.mxu1 %vm508_vm0, %v651_v18 }
 0x150   : > { %v3515_v21 = vpop.eup %3514  ;;  %3274 = vmatpush3.xpose.msk.msra.mxu0 %vm508_vm0, %v646_v13  ;;  %3528 = vrsqrt.f32 %v751_v41 }
 0x151   : > { %v3517_v33 = vpop.eup %3516  ;;  %3275 = vmatprep.subr.msk.mxu0 %vm508_vm0, %v645_v23  ;;  %v848_v58 = vmul.f32 %v3515_v21, %v4424_v38 }
 0x152   : > { %3294 = vmatpush3.xpose.msk.msra.mxu1 %vm508_vm0, %v651_v18  ;;  %v766_v30 = vpop.xlane.xlu1 %765  ;;  %v568_v17 = vpop.xlane.xlu0 %567  ;;  %v650_v59 = vmul.f32 %v3517_v33, %v4427_v39 }
 0x153   : > { %3530 = vrsqrt.f32 %v766_v30  ;;  %v3838_v30 = vld [vmem:[%s4243_s27 + $0xd8] sm:$0xff] }
 0x154   : > { %v3519_v31 = vpop.eup %3518  ;;  %3276 = vmatpush3.xpose.msk.msra.mxu0 %vm508_vm0, %v645_v23  ;;  %3532 = vrsqrt.f32 %v568_v17  ;;  %3295 = vmatprep.subr.msk.mxu1 %vm508_vm0, %v650_v59  ;;  %v5509_v23 = vld [vmem:[#allocation18_spill] sm:$0xff] }
 0x155   : > { %v3521_v55 = vpop.eup %3520  ;;  %3305 = vmatprep.subr.msk.mxu0 %vm508_vm0, %v848_v58  ;;  %v847_v34 = vmul.f32 %v3519_v31, %v4436_v48 }
 0x156   : > { %3296 = vmatpush3.xpose.msk.msra.mxu1 %vm508_vm0, %v650_v59  ;;  %v763_v38 = vpop.xlane.xlu1 %762  ;;  %v565_v46 = vpop.xlane.xlu0 %564  ;;  %v649_v56 = vmul.f32 %v3521_v55, %v4439_v49  ;;  %v3839_v55 = vld [vmem:[%s4237_s10 + $0xa8] sm:$0xff] }
 0x157   : > { %3278 = vmatmul.mubr.msk.f32.vlgmr.msra.gmra.mxu0 %vm508_vm0, %v4610_v32  ;;  %3534 = vrsqrt.f32 %v763_v38 }
 0x158   : > { %v3523_v39 = vpop.eup %3522  ;;  %3306 = vmatpush3.xpose.msk.msra.mxu0 %vm508_vm0, %v848_v58  ;;  %3536 = vrsqrt.f32 %v565_v46  ;;  %3297 = vmatprep.subr.msk.mxu1 %vm508_vm0, %v649_v56 }
 0x159   : > { %v3525_v47 = vpop.eup %3524  ;;  %3307 = vmatprep.subr.msk.mxu0 %vm508_vm0, %v847_v34  ;;  %v852_v48 = vmul.f32 %v3523_v39, %v4453_v57  ;;  %3280 = vmatprep.mubr.msk.f32.mxu0 %vm508_vm0, %v4627_v44 }
 0x15a   : > { %3298 = vmatpush3.xpose.msk.msra.mxu1 %vm508_vm0, %v649_v56  ;;  %v580_v49 = vpop.xlane.xlu1 %579  ;;  %v562_v42 = vpop.xlane.xlu0 %561  ;;  %v846_v32 = vmul.f32 %v3525_v47, %v4456_v60  ;;  %v3840_v56 = vld [vmem:[%s4243_s27 + $0xd0] sm:$0xff] }
 0x15b   : > { %3538 = vrsqrt.f32 %v580_v49  ;;  %3327 = vmatprep.subr.msk.mxu1 %vm508_vm0, %v852_v48  ;;  %3281 = vmatmul.mubr.msk.f32.gmra.mxu0 %vm508_vm0, %v4622_v26  ;;  %v3841_v49 = vld [vmem:[%s4237_s10 + $0xa0] sm:$0xff] }
 0x15c   : > { %v3527_v43 = vpop.eup %3526  ;;  %3308 = vmatpush3.xpose.msk.msra.mxu0 %vm508_vm0, %v847_v34  ;;  %3540 = vrsqrt.f32 %v562_v42  ;;  %3321 = vmatprep.mubr.msk.f32.mxu0 %vm508_vm0, %v4672_v6 }
 0x15d   : > { %v3529_v57 = vpop.eup %3528  ;;  %3309 = vmatprep.subr.msk.mxu0 %vm508_vm0, %v846_v32  ;;  %3300 = vmatmul.mubr.msk.f32.vlgmr.msra.gmra.mxu1 %vm508_vm0, %v4641_v37  ;;  %v851_v60 = vmul.f32 %v3527_v43, %v4470_v10 }
 0x15e   : > { %3328 = vmatpush3.xpose.msk.msra.mxu1 %vm508_vm0, %v852_v48  ;;  %v577_v44 = vpop.xlane.xlu1 %576  ;;  %v559_v35 = vpop.xlane.xlu0 %558  ;;  %v845_v26 = vmul.f32 %v3529_v57, %v4473_v11  ;;  %3302 = vmatprep.mubr.msk.f32.mxu1 %vm508_vm0, %v4659_v5 }
 0x15f   : > { %3542 = vrsqrt.f32 %v577_v44  ;;  %3329 = vmatprep.subr.msk.mxu1 %vm508_vm0, %v851_v60 }
 0x160   : > { %v3531_v6 = vpop.eup %3530  ;;  %3310 = vmatpush3.xpose.msk.msra.mxu0 %vm508_vm0, %v846_v32  ;;  %3544 = vrsqrt.f32 %v559_v35  ;;  %v5510_v32 = vld [vmem:[#allocation19_spill] sm:$0xff] }
 0x161   : > { %v3533_v3 = vpop.eup %3532  ;;  %3311 = vmatprep.subr.msk.mxu0 %vm508_vm0, %v845_v26  ;;  %v850_v10 = vmul.f32 %v3531_v6, %v4482_v24  ;;  %3303 = vmatmul.mubr.msk.f32.gmra.mxu1 %vm508_vm0, %v4653_v0  ;;  %v3843_v6 = vld [vmem:[%s4243_s27 + $0xc8] sm:$0xff] }
 0x162   : > { %3330 = vmatpush3.xpose.msk.msra.mxu1 %vm508_vm0, %v851_v60  ;;  %v784_v11 = vpop.xlane.xlu1 %783  ;;  %v574_v37 = vpop.xlane.xlu0 %573  ;;  %v656_v5 = vmul.f32 %v3533_v3, %v4485_v25  ;;  %3343 = vmatprep.mubr.msk.f32.mxu1 %vm508_vm0, %v4709_v2  ;;  %v5505_v25 = vld [vmem:[#allocation14_spill] sm:$0xff]  ;;  %v3842_v60 = vld [vmem:[%s4243_s27 + $0xf8] sm:$0xff] }
 0x163   : > { %3546 = vrsqrt.f32 %v784_v11  ;;  %3331 = vmatprep.subr.msk.mxu1 %vm508_vm0, %v850_v10 }
 0x164   : > { %v3535_v51 = vpop.eup %3534  ;;  %3312 = vmatpush3.xpose.msk.msra.mxu0 %vm508_vm0, %v845_v26  ;;  %3548 = vrsqrt.f32 %v574_v37  ;;  %v3844_v37 = vld [vmem:[%s4243_s27 + $0xf0] sm:$0xff] }
 0x165   : > { %v3537_v24 = vpop.eup %3536  ;;  %3313 = vmatprep.subr.msk.mxu0 %vm508_vm0, %v656_v5  ;;  %v849_v0 = vmul.f32 %v3535_v51, %v4494_v36 }
 0x166   : > { %3332 = vmatpush3.xpose.msk.msra.mxu1 %vm508_vm0, %v850_v10  ;;  %v781_v28 = vpop.xlane.xlu1 %780  ;;  %v571_v4 = vpop.xlane.xlu0 %570  ;;  %v655_v9 = vmul.f32 %v3537_v24, %v5505_v25  ;;  %v5511_v10 = vld [vmem:[#allocation20_spill] sm:$0xff] }
 0x167   : > { %3550 = vrsqrt.f32 %v781_v28  ;;  %3333 = vmatprep.subr.msk.mxu1 %vm508_vm0, %v849_v0 }
 0x168   : > { %v3539_v2 = vpop.eup %3538  ;;  %3314 = vmatpush3.xpose.msk.msra.mxu0 %vm508_vm0, %v656_v5  ;;  %3552 = vrsqrt.f32 %v571_v4  ;;  %v3846_v4 = vld [vmem:[%s4243_s27 + $0xe8] sm:$0xff] }
 0x169   : > { %v3541_v1 = vpop.eup %3540  ;;  %3315 = vmatprep.subr.msk.mxu0 %vm508_vm0, %v655_v9  ;;  %v660_v52 = vmul.f32 %v3539_v2, %v5506_v61 }
 0x16a   : > { %3334 = vmatpush3.xpose.msk.msra.mxu1 %vm508_vm0, %v849_v0  ;;  %v796_v36 = vpop.xlane.xlu1 %795  ;;  %v778_v12 = vpop.xlane.xlu0 %777  ;;  %v654_v62 = vmul.f32 %v3541_v1, %v5507_v53  ;;  %v3845_v0 = vld [vmem:[%s4243_s27 + $0xc0] sm:$0xff] }
 0x16b   : > { %3554 = vrsqrt.f32 %v796_v36  ;;  %3335 = vmatprep.subr.msk.mxu1 %vm508_vm0, %v660_v52 }
 0x16c   : > { %v3543_v13 = vpop.eup %3542  ;;  %3316 = vmatpush3.xpose.msk.msra.mxu0 %vm508_vm0, %v655_v9  ;;  %3556 = vrsqrt.f32 %v778_v12  ;;  %v3847_v9 = vld [vmem:[%s4237_s10 + $0xd8] sm:$0xff]  ;;  %v3849_v12 = vld [vmem:[%s4237_s10 + $0xd0] sm:$0xff] }
 0x16d   : > { %v3545_v40 = vpop.eup %3544  ;;  %3317 = vmatprep.subr.msk.mxu0 %vm508_vm0, %v654_v62  ;;  %v659_v18 = vmul.f32 %v3543_v13, %v5508_v45  ;;  %v3850_v13 = vld [vmem:[%s4237_s10 + $0xf8] sm:$0xff]  ;;  %v3851_v45 = vld [vmem:[%s4237_s10 + $0xc8] sm:$0xff] }
 0x16e   : > { %3336 = vmatpush3.xpose.msk.msra.mxu1 %vm508_vm0, %v660_v52  ;;  %v793_v20 = vpop.xlane.xlu1 %792  ;;  %v775_v41 = vpop.xlane.xlu0 %774  ;;  %v653_v21 = vmul.f32 %v3545_v40, %v5509_v23  ;;  %v3848_v52 = vld [vmem:[%s4243_s27 + $0xe0] sm:$0xff]  ;;  %v3852_v23 = vld [vmem:[%s4237_s10 + $0xf0] sm:$0xff]  ;;  %s4016_s27 = smov [#allocation8]  }
 0x16f   : > { %3558 = vrsqrt.f32 %v793_v20  ;;  %3337 = vmatprep.subr.msk.mxu1 %vm508_vm0, %v659_v18  ;;  %s3944_s22 = sshll.u32 %s4016_s27, 4  ;;  %s3945_s22 = int_to_ptr.vmem [resolvable:$false] %s3944_s22 }
 0x170   : > { %v3547_v33 = vpop.eup %3546  ;;  %3318 = vmatpush3.xpose.msk.msra.mxu0 %vm508_vm0, %v654_v62  ;;  %3560 = vrsqrt.f32 %v775_v41  ;;  %s3946_s28 = scalar_lea.vmem %s3945_s22, 256  ;;  %p3947_p2 = scmp.lt.s32.totalorder %s5420_s11, %s3945_s22 }
 0x171   : > { %v3549_v58 = vpop.eup %3548  ;;  %3319 = vmatprep.subr.msk.mxu0 %vm508_vm0, %v653_v21  ;;  %v856_v17 = vmul.f32 %v3838_v30, %v3547_v33  ;;  %v3853_v33 = vld [vmem:[%s4237_s10 + $0xc0] sm:$0xff] }
 0x172   : > { %3338 = vmatpush3.xpose.msk.msra.mxu1 %vm508_vm0, %v659_v18  ;;  %v790_v59 = vpop.xlane.xlu1 %789  ;;  %v592_v31 = vpop.xlane.xlu0 %591  ;;  %v658_v34 = vmul.f32 %v3839_v55, %v3549_v58  ;;  %v3855_v55 = vld [vmem:[%s4237_s10 + $0xe0] sm:$0xff] }
 0x173   : > { %3562 = vrsqrt.f32 %v790_v59  ;;  %v3854_v59 = vld [vmem:[%s4237_s10 + $0xe8] sm:$0xff]  ;;  %s3940_s10 = scalar_lea.vmem %s5420_s11, 128 }
 0x174   : > { %v3551_v38 = vpop.eup %3550  ;;  %3320 = vmatpush3.xpose.msk.msra.mxu0 %vm508_vm0, %v653_v21  ;;  %3564 = vrsqrt.f32 %v592_v31  ;;  %3339 = vmatprep.subr.msk.mxu1 %vm508_vm0, %v658_v34  ;;  %p3941_p7 = scmp.ne.s32.totalorder %s5420_s11, %s3940_s10  ;;  %p3948_p11 = scmp.lt.s32.totalorder %s3946_s28, %s3940_s10 }
 0x175   : > { %v3553_v46 = vpop.eup %3552  ;;  %3349 = vmatprep.subr.msk.mxu0 %vm508_vm0, %v856_v17  ;;  %v855_v39 = vmul.f32 %v3840_v56, %v3551_v38 }
 0x176   : > { %3340 = vmatpush3.xpose.msk.msra.mxu1 %vm508_vm0, %v658_v34  ;;  %v787_v47 = vpop.xlane.xlu1 %786  ;;  %v589_v48 = vpop.xlane.xlu0 %588  ;;  %v657_v42 = vmul.f32 %v3841_v49, %v3553_v46  ;;  %p3942_p9 = pnand %p3941_p7, %p5512_p8  ;;  %p3949_p6 = por %p3948_p11, %p3947_p2 }
 0x177   : > { %3322 = vmatmul.mubr.msk.f32.vlgmr.msra.gmra.mxu0 %vm508_vm0, %v5510_v32  ;;  %3566 = vrsqrt.f32 %v787_v47 }
 0x178   : > { %v3555_v43 = vpop.eup %3554  ;;  %3350 = vmatpush3.xpose.msk.msra.mxu0 %vm508_vm0, %v856_v17  ;;  %3568 = vrsqrt.f32 %v589_v48  ;;  %3341 = vmatprep.subr.msk.mxu1 %vm508_vm0, %v657_v42  ;;  %p3943_p0 = pneg %p3942_p9 }
 0x179   : > { %v3557_v57 = vpop.eup %3556  ;;  %3351 = vmatprep.subr.msk.mxu0 %vm508_vm0, %v855_v39  ;;  %v860_v44 = vmul.f32 %v3842_v60, %v3555_v43  ;;  %3324 = vmatprep.mubr.msk.f32.mxu0 %vm508_vm0, %v4691_v27 }
 0x17a   : > { %3342 = vmatpush3.xpose.msk.msra.mxu1 %vm508_vm0, %v657_v42  ;;  %v604_v35 = vpop.xlane.xlu1 %603  ;;  %v586_v26 = vpop.xlane.xlu0 %585  ;;  %v854_v3 = vmul.f32 %v3843_v6, %v3557_v57  ;;  %p3950_p13 = pnand %p3949_p6, %p3943_p0 }
 0x17b   : > { %3570 = vrsqrt.f32 %v604_v35  ;;  %3371 = vmatprep.subr.msk.mxu1 %vm508_vm0, %v860_v44  ;;  %3325 = vmatmul.mubr.msk.f32.gmra.mxu0 %vm508_vm0, %v5511_v10 }
 0x17c   : > { %v3559_v11 = vpop.eup %3558  ;;  %3352 = vmatpush3.xpose.msk.msra.mxu0 %vm508_vm0, %v855_v39  ;;  %3572 = vrsqrt.f32 %v586_v26  ;;  %3365 = vmatprep.mubr.msk.f32.mxu0 %vm508_vm0, %v4754_v29 }
 0x17d   : > { %v3561_v27 = vpop.eup %3560  ;;  %3353 = vmatprep.subr.msk.mxu0 %vm508_vm0, %v854_v3  ;;  %3344 = vmatmul.mubr.msk.f32.vlgmr.msra.gmra.mxu1 %vm508_vm0, %v4704_v50  ;;  %v859_v5 = vmul.f32 %v3844_v37, %v3559_v11 }
 0x17e   : > { %3372 = vmatpush3.xpose.msk.msra.mxu1 %vm508_vm0, %v860_v44  ;;  %v601_v51 = vpop.xlane.xlu1 %600  ;;  %v583_v24 = vpop.xlane.xlu0 %582  ;;  %v853_v28 = vmul.f32 %v3845_v0, %v3561_v27  ;;  %3346 = vmatprep.mubr.msk.f32.mxu1 %vm508_vm0, %v4727_v54 }
 0x17f   : > { %3574 = vrsqrt.f32 %v601_v51  ;;  %3373 = vmatprep.subr.msk.mxu1 %vm508_vm0, %v859_v5 }
 0x180   : > { %v3563_v29 = vpop.eup %3562  ;;  %3354 = vmatpush3.xpose.msk.msra.mxu0 %vm508_vm0, %v854_v3  ;;  %3576 = vrsqrt.f32 %v583_v24 }
 0x181   : > { %v3565_v50 = vpop.eup %3564  ;;  %3355 = vmatprep.subr.msk.mxu0 %vm508_vm0, %v853_v28  ;;  %v858_v25 = vmul.f32 %v3846_v4, %v3563_v29  ;;  %3347 = vmatmul.mubr.msk.f32.gmra.mxu1 %vm508_vm0, %v4722_v14 }
 0x182   : > { %3374 = vmatpush3.xpose.msk.msra.mxu1 %vm508_vm0, %v859_v5  ;;  %v598_v54 = vpop.xlane.xlu0 %597  ;;  %v664_v2 = vmul.f32 %v3847_v9, %v3565_v50  ;;  %v595_v1 = vpop.xlane.xlu1 %594  ;;  %3387 = vmatprep.mubr.msk.f32.mxu1 %vm508_vm0, %v4794_v7  ;;  %v3096_v9 = vld [vmem:[%s5021_s12 + $0x1] ss:$0 sm:$0xff] }
 0x183   : > { %3578 = vrsqrt.f32 %v598_v54  ;;  %3375 = vmatprep.subr.msk.mxu1 %vm508_vm0, %v858_v25 }
 0x184   : > { %v3567_v61 = vpop.eup %3566  ;;  %3356 = vmatpush3.xpose.msk.msra.mxu0 %vm508_vm0, %v853_v28  ;;  %3580 = vrsqrt.f32 %v595_v1 }
 0x185   : > { %v3569_v14 = vpop.eup %3568  ;;  %3357 = vmatprep.subr.msk.mxu0 %vm508_vm0, %v664_v2  ;;  %v857_v36 = vmul.f32 %v3848_v52, %v3567_v61 }
 0x186   : > { %3376 = vmatpush3.xpose.msk.msra.mxu1 %vm508_vm0, %v858_v25  ;;  %v663_v53 = vmul.f32 %v3849_v12, %v3569_v14  ;;  %v895_v38 = vpop.xlane.xlu0 %894  ;;  %v5027_v14 = vld [vmem:[%s5021_s12] ss:$0 sm:$0xff] }
 0x187   : > { %3377 = vmatprep.subr.msk.mxu1 %vm508_vm0, %v857_v36 }
 0x188   : > { %v3571_v7 = vpop.eup %3570  ;;  %3358 = vmatpush3.xpose.msk.msra.mxu0 %vm508_vm0, %v664_v2 }
 0x189   : > { %v3573_v62 = vpop.eup %3572  ;;  %3359 = vmatprep.subr.msk.mxu0 %vm508_vm0, %v663_v53  ;;  %v668_v40 = vmul.f32 %v3850_v13, %v3571_v7 }
 0x18a   : > { %3378 = vmatpush3.xpose.msk.msra.mxu1 %vm508_vm0, %v857_v36  ;;  %v662_v18 = vmul.f32 %v3851_v45, %v3573_v62  ;;  %v5005_v56 = vpop.xlane.xlu0 %900 }
 0x18b   : > { %3379 = vmatprep.subr.msk.mxu1 %vm508_vm0, %v668_v40 }
 0x18c   : > { %v3575_v20 = vpop.eup %3574  ;;  %3360 = vmatpush3.xpose.msk.msra.mxu0 %vm508_vm0, %v663_v53 }
 0x18d   : > { %v3577_v41 = vpop.eup %3576  ;;  %3361 = vmatprep.subr.msk.mxu0 %vm508_vm0, %v662_v18  ;;  %v667_v21 = vmul.f32 %v3852_v23, %v3575_v20 }
 0x18e   : > { %3380 = vmatpush3.xpose.msk.msra.mxu1 %vm508_vm0, %v668_v40  ;;  %v661_v58 = vmul.f32 %v3853_v33, %v3577_v41  ;;  %v907_v39 = vpop.xlane.xlu0 %906 }
 0x18f   : > { %3381 = vmatprep.subr.msk.mxu1 %vm508_vm0, %v667_v21 }
 0x190   : > { %v3579_v30 = vpop.eup %3578  ;;  %3362 = vmatpush3.xpose.msk.msra.mxu0 %vm508_vm0, %v662_v18 }
 0x191   : > { %v3581_v17 = vpop.eup %3580  ;;  %3363 = vmatprep.subr.msk.mxu0 %vm508_vm0, %v661_v58  ;;  %v666_v31 = vmul.f32 %v3854_v59, %v3579_v30 }
 0x192   : > { %3382 = vmatpush3.xpose.msk.msra.mxu1 %vm508_vm0, %v667_v21  ;;  %v665_v34 = vmul.f32 %v3855_v55, %v3581_v17  ;;  %v913_v1 = vpop.xlane.xlu0 %912 }
 0x193   : > { %3383 = vmatprep.subr.msk.mxu1 %vm508_vm0, %v666_v31 }
 0x194   : > { %3364 = vmatpush3.xpose.msk.msra.mxu0 %vm508_vm0, %v661_v58 }
 0x196   : > { %3384 = vmatpush3.xpose.msk.msra.mxu1 %vm508_vm0, %v666_v31 }
 0x197   : > { %3366 = vmatmul.mubr.msk.f32.vlgmr.msra.gmra.mxu0 %vm508_vm0, %v4740_v15  ;;  %3385 = vmatprep.subr.msk.mxu1 %vm508_vm0, %v665_v34  ;;  %v898_v15 = vpop.xlane.xlu1 %897 }
 0x198   : > { %3368 = vmatprep.mubr.msk.f32.mxu0 %vm508_vm0, %v4774_v8  ;;  %3582 = vrsqrt.f32 %v898_v15 }
 0x199   : > { %3584 = vrsqrt.f32 %v895_v38 }
 0x19a   : > { %3386 = vmatpush3.xpose.msk.msra.mxu1 %vm508_vm0, %v665_v34  ;;  %v919_v17 = vpop.xlane.xlu0 %918 }
 0x19b   : > { %3369 = vmatmul.mubr.msk.f32.gmra.mxu0 %vm508_vm0, %v4757_v63  ;;  %v904_v46 = vpop.xlane.xlu1 %903 }
 0x19d   : > { %3388 = vmatmul.mubr.msk.f32.vlgmr.msra.gmra.mxu1 %vm508_vm0, %v4788_v22 }
 0x19e   : > { %3390 = vmatprep.mubr.msk.f32.mxu1 %vm508_vm0, %v4817_v19 }
 0x19f   : > { %v910_v8 = vpop.xlane.xlu1 %909 }
 0x1a0   : > { %3586 = vrsqrt.f32 %v910_v8 }
 0x1a1   : > { %3391 = vmatmul.mubr.msk.f32.gmra.mxu1 %vm508_vm0, %v4813_v16  ;;  %3588 = vrsqrt.f32 %v907_v39 }
 0x1a2   : > { %v925_v59 = vpop.xlane.xlu0 %924 }
 0x1a3   : > { %v916_v63 = vpop.xlane.xlu1 %915 }
 0x1a4   : > { %3590 = vrsqrt.f32 %v916_v63 }
 0x1a5   : > { %v3583_v22 = vpop.eup %3582 }
 0x1a6   : > { %v3585_v47 = vpop.eup %3584  ;;  %v1022_v19 = vmul.f32 0.1, %v3583_v22 }
 0x1a7   : > { %v1021_v49 = vmul.f32 0.1, %v3585_v47  ;;  %v931_v31 = vpop.xlane.xlu0 %930  ;;  %v922_v63 = vpop.xlane.xlu1 %921 }
 0x1ad   : > { %v3587_v48 = vpop.eup %3586 }
 0x1ae   : > { %v3589_v16 = vpop.eup %3588  ;;  %v1026_v57 = vmul.f32 0.1, %v3587_v48 }
 0x1af   : > { %v1025_v26 = vmul.f32 0.1, %v3589_v16 }
 0x1b1   : > { %v3591_v60 = vpop.eup %3590 }
 0x1b2   : > { %v1028_v11 = vmul.f32 0.1, %v3591_v60 }
 0x1f7   : > { %v3235_v42 = vpop.f32.mrf.mxu0 }
 0x1f8   : > { %v2022_v32 = vmul.f32 %v3235_v42, %v1022_v19 }
 0x1f9   : > { %v1155_v43 = vpop.f32.mrf.mxu0 }
 0x1fa   : > { %v2055_v44 = vmul.f32 1.442695, %v2022_v32  ;;  %v2021_v35 = vmul.f32 %v1155_v43, %v1021_v49 }
 0x1fb   : > { %v3238_v13 = vpop.f32.mrf.mxu0 }
 0x1fc   : > { %3592 = vpow2.f32 %v2055_v44  ;;  %v2053_v6 = vmul.f32 1.442695, %v2021_v35  ;;  %v3257_v3 = vpop.f32.mrf.mxu1 }
 0x1fd   : > { %v2026_v10 = vmul.f32 %v3257_v3, %v1026_v57  ;;  %v1165_v34 = vpop.f32.mrf.mxu0  ;;  %v928_v57 = vpop.xlane.xlu1 %927 }
 0x1fe   : > { %3594 = vpow2.f32 %v2053_v6  ;;  %v1276_v27 = vpop.f32.mrf.mxu1 }
 0x1ff   : > { %v2063_v37 = vmul.f32 1.442695, %v2026_v10  ;;  %v2025_v5 = vmul.f32 %v1276_v27, %v1025_v26 }
 0x200   : > { %v3260_v51 = vpop.f32.mrf.mxu1 }
 0x201   : > { %3596 = vpow2.f32 %v2063_v37  ;;  %v2061_v24 = vmul.f32 1.442695, %v2025_v5  ;;  %v2028_v0 = vmul.f32 %v3260_v51, %v1028_v11  ;;  %v934_v10 = vpop.xlane.xlu1 %933 }
 0x202   : > { %v1286_v12 = vpop.f32.mrf.mxu1 }
 0x203   : > { %3598 = vpow2.f32 %v2061_v24  ;;  %v2067_v28 = vmul.f32 1.442695, %v2028_v0 }
 0x205   : > { %3600 = vpow2.f32 %v2067_v28  ;;  %v937_v28 = vpop.xlane.xlu0 %936 }
 0x206   : > { %3602 = vrsqrt.f32 %v913_v1 }
 0x207   : > { %3604 = vrsqrt.f32 %v904_v46 }
 0x209   : > { %v3593_v29 = vpop.eup %3592 }
 0x20a   : > { %2327 = vrot.lane.b32.xlu1 %v3593_v29, %s4015_s17  ;;  %v2166_v62 = vmul.f32 %v3593_v29, %v5027_v14 }
 0x20b   : > { %v3595_v50 = vpop.eup %3594 }
 0x20c   : > { %2325 = vrot.lane.b32.xlu0 %v3595_v50, %s4015_s17  ;;  %v2165_v36 = vmul.f32 %v3595_v50, %v5027_v14  ;;  %v2200_v41 = vsel %vm508_vm0, %v2166_v62, 0.0  ;;  %v5047_v50 = vld [vmem:[%s5021_s12 + $0x3] ss:$0 sm:$0xff] }
 0x20e   : > { %v3597_v4 = vpop.eup %3596  ;;  %v2197_v40 = vsel %vm508_vm0, %v2165_v36, 0.0 }
 0x20f   : > { %2335 = vrot.lane.b32.xlu1 %v3597_v4, %s4015_s17  ;;  %v2170_v23 = vmul.f32 %v3597_v4, %v3096_v9 }
 0x210   : > { %v5013_v25 = vpop.eup %3598 }
 0x211   : > { %2333 = vrot.lane.b32.xlu0 %v5013_v25, %s4015_s17  ;;  %v2212_v33 = vsel %vm508_vm0, %v2170_v23, 0.0  ;;  %v2169_v35 = vmul.f32 %v5013_v25, %v3096_v9 }
 0x212   : > { %v3601_v54 = vpop.eup %3600 }
 0x213   : > { %v5024_v2 = vmul.f32 %v3601_v54, %v3096_v9  ;;  %v3603_v61 = vpop.eup %3602  ;;  %v2209_v3 = vsel %vm508_vm0, %v2169_v35, 0.0 }
 0x214   : > { %v1027_v52 = vmul.f32 0.1, %v3603_v61  ;;  %v3605_v53 = vpop.eup %3604 }
 0x215   : > { %v1024_v45 = vmul.f32 0.1, %v3605_v53  ;;  %v2218_v62 = vsel %vm508_vm0, %v5024_v2, 0.0 }
 0x216   : > { %v2027_v7 = vmul.f32 %v1286_v12, %v1027_v52 }
 0x217   : > { %v2024_v18 = vmul.f32 %v3238_v13, %v1024_v45  ;;  %v3279_v38 = vpop.f32.mrf.mxu0 }
 0x218   : > { %v2065_v20 = vmul.f32 1.442695, %v2027_v7 }
 0x219   : > { %v2059_v21 = vmul.f32 1.442695, %v2024_v18  ;;  %v1397_v49 = vpop.f32.mrf.mxu0 }
 0x21a   : > { %3606 = vpow2.f32 %v2065_v20 }
 0x21b   : > { %3608 = vpow2.f32 %v2059_v21  ;;  %v3282_v45 = vpop.f32.mrf.mxu0 }
 0x21c   : > { %3610 = vrsqrt.f32 %v919_v17 }
 0x21d   : > { %3612 = vrsqrt.f32 %v5005_v56  ;;  %v3301_v48 = vpop.f32.mrf.mxu1  ;;  %v1407_v18 = vpop.f32.mrf.mxu0 }
 0x21e   : > { %3614 = vrsqrt.f32 %v931_v31 }
 0x21f   : > { %v1518_v32 = vpop.f32.mrf.mxu1 }
 0x227   : > { %v3607_v58 = vpop.eup %3606 }
 0x228   : > { %v3609_v30 = vpop.eup %3608  ;;  %v2171_v47 = vmul.f32 %v3607_v58, %v3096_v9 }
 0x229   : > { %v3611_v55 = vpop.eup %3610  ;;  %v2168_v15 = vmul.f32 %v3609_v30, %v5027_v14 }
 0x22a   : > { %v3613_v46 = vpop.eup %3612  ;;  %v1029_v8 = vmul.f32 0.1, %v3611_v55  ;;  %v2215_v16 = vsel %vm508_vm0, %v2171_v47, 0.0  ;;  %v943_v55 = vpop.xlane.xlu0 %942 }
 0x22b   : > { %v3615_v39 = vpop.eup %3614  ;;  %v2206_v22 = vsel %vm508_vm0, %v2168_v15, 0.0  ;;  %v1023_v19 = vmul.f32 0.1, %v3613_v46 }
 0x22c   : > { %v2029_v42 = vmul.f32 %v1397_v49, %v1029_v8  ;;  %v1033_v56 = vmul.f32 0.1, %v3615_v39 }
 0x22d   : > { %v2023_v43 = vmul.f32 %v1165_v34, %v1023_v19 }
 0x22e   : > { %v2069_v60 = vmul.f32 1.442695, %v2029_v42  ;;  %v2033_v44 = vmul.f32 %v1518_v32, %v1033_v56  ;;  %v949_v8 = vpop.xlane.xlu0 %948 }
 0x22f   : > { %v2057_v26 = vmul.f32 1.442695, %v2023_v43 }
 0x230   : > { %2198 = vadd.xlane.f32.xlu0 %v2197_v40  ;;  %3616 = vpow2.f32 %v2069_v60  ;;  %v2077_v6 = vmul.f32 1.442695, %v2033_v44 }
 0x231   : > { %3618 = vrsqrt.f32 %v934_v10 }
 0x232   : > { %3620 = vpow2.f32 %v2057_v26 }
 0x233   : > { %2201 = vadd.xlane.f32.xlu1 %v2200_v41  ;;  %3622 = vpow2.f32 %v2077_v6 }
 0x237   : > { %2213 = vadd.xlane.f32.xlu1 %v2212_v33  ;;  %v5083_v6 = vpop.f32.mrf.mxu0 }
 0x23d   : > { %v3617_v11 = vpop.eup %3616 }
 0x23e   : > { %v3619_v27 = vpop.eup %3618 }
 0x23f   : > { %v3621_v37 = vpop.eup %3620  ;;  %v1034_v51 = vmul.f32 0.1, %v3619_v27 }
 0x240   : > { %v3623_v5 = vpop.eup %3622  ;;  %v2167_v13 = vmul.f32 %v3621_v37, %v5027_v14 }
 0x241   : > { %v2034_v24 = vmul.f32 %v3301_v48, %v1034_v51  ;;  %v2177_v12 = vmul.f32 %v3623_v5, %v5047_v50 }
 0x242   : > { %v2203_v33 = vsel %vm508_vm0, %v2167_v13, 0.0 }
 0x243   : > { %v2079_v0 = vmul.f32 1.442695, %v2034_v24  ;;  %v2233_v20 = vsel %vm508_vm0, %v2177_v12, 0.0 }
 0x245   : > { %3624 = vpow2.f32 %v2079_v0  ;;  %v1639_v0 = vpop.f32.mrf.mxu0 }
 0x246   : > { %2337 = vrot.lane.b32.xlu0 %v3607_v58, %s4015_s17  ;;  %3626 = vrsqrt.f32 %v922_v63  ;;  %v3304_v58 = vpop.f32.mrf.mxu1 }
 0x247   : > { %3628 = vrsqrt.f32 %v925_v59 }
 0x248   : > { %2331 = vrot.lane.b32.xlu1 %v3609_v30, %s4015_s17  ;;  %3630 = vrsqrt.f32 %v937_v28  ;;  %v1528_v30 = vpop.f32.mrf.mxu1 }
 0x24a   : > { %v5089_v51 = vpop.f32.mrf.mxu1 }
 0x24c   : > { %2339 = vrot.lane.b32.xlu1 %v3601_v54, %s4015_s17  ;;  %v5051_v54 = vld [vmem:[%s5021_s12 + $0x2] ss:$0 sm:$0xff] }
 0x24d   : > { %v2173_v9 = vmul.f32 %v3617_v11, %v5051_v54 }
 0x24f   : > { %v2221_v36 = vsel %vm508_vm0, %v2173_v9, 0.0 }
 0x252   : > { %v3625_v29 = vpop.eup %3624 }
 0x253   : > { %v3627_v4 = vpop.eup %3626  ;;  %v2178_v25 = vmul.f32 %v3625_v29, %v5047_v50 }
 0x254   : > { %v1030_v1 = vmul.f32 0.1, %v3627_v4  ;;  %v3629_v61 = vpop.eup %3628 }
 0x255   : > { %v2236_v52 = vsel %vm508_vm0, %v2178_v25, 0.0  ;;  %v1031_v7 = vmul.f32 0.1, %v3629_v61  ;;  %v3631_v40 = vpop.eup %3630 }
 0x256   : > { %v2030_v53 = vmul.f32 %v3279_v38, %v1030_v1  ;;  %v1035_v21 = vmul.f32 0.1, %v3631_v40  ;;  %v940_v38 = vpop.xlane.xlu1 %939  ;;  %v1760_v1 = vpop.f32.mrf.mxu1 }
 0x257   : > { %v2031_v23 = vmul.f32 %v1407_v18, %v1031_v7  ;;  %v5093_v7 = vpop.f32.mrf.mxu0 }
 0x258   : > { %v2071_v41 = vmul.f32 1.442695, %v2030_v53  ;;  %v2035_v17 = vmul.f32 %v1528_v30, %v1035_v21 }
 0x259   : > { %v2073_v2 = vmul.f32 1.442695, %v2031_v23  ;;  %v1649_v13 = vpop.f32.mrf.mxu0 }
 0x25a   : > { %3632 = vpow2.f32 %v2071_v41  ;;  %v2081_v14 = vmul.f32 1.442695, %v2035_v17  ;;  %v5069_v63 = vpop.xlane.xlu1 %945 }
 0x25b   : > { %3634 = vpow2.f32 %v2073_v2  ;;  %v5097_v23 = vpop.f32.mrf.mxu0 }
 0x25c   : > { %3636 = vrsqrt.f32 %v928_v57 }
 0x25d   : > { %3638 = vpow2.f32 %v2081_v14  ;;  %v1881_v17 = vpop.f32.mrf.mxu0 }
 0x25e   : > { %3640 = vrsqrt.f32 %v940_v38  ;;  %v5071_v48 = vpop.xlane.xlu1 %951 }
 0x262   : > { %v5073_v49 = vpop.xlane.xlu1 %957 }
 0x265   : > { %2207 = vadd.xlane.f32.xlu0 %v2206_v22  ;;  %v955_v22 = vpop.xlane.xlu0 %954 }
 0x267   : > { %v3633_v59 = vpop.eup %3632 }
 0x268   : > { %v3635_v31 = vpop.eup %3634  ;;  %v2174_v60 = vmul.f32 %v3633_v59, %v5051_v54 }
 0x269   : > { %2216 = vadd.xlane.f32.xlu0 %v2215_v16  ;;  %v3637_v34 = vpop.eup %3636  ;;  %v961_v19 = vpop.xlane.xlu0 %960 }
 0x26a   : > { %v5065_v15 = vpop.eup %3638  ;;  %v1032_v46 = vmul.f32 0.1, %v3637_v34  ;;  %v5075_v16 = vpop.xlane.xlu1 %963 }
 0x26b   : > { %v3641_v56 = vpop.eup %3640 }
 0x26c   : > { %v2032_v39 = vmul.f32 %v3282_v45, %v1032_v46  ;;  %v1036_v57 = vmul.f32 0.1, %v3641_v56  ;;  %v3370_v46 = vpop.f32.mrf.mxu0 }
 0x26d   : > { %v967_v42 = vpop.xlane.xlu0 %966 }
 0x26e   : > { %v2075_v47 = vmul.f32 1.442695, %v2032_v39  ;;  %v5081_v26 = vpop.xlane.xlu1 %969  ;;  %v2036_v10 = vmul.f32 %v3304_v58, %v1036_v57 }
 0x270   : > { %2210 = vadd.xlane.f32.xlu1 %v2209_v3  ;;  %3642 = vpow2.f32 %v2075_v47  ;;  %v2175_v3 = vmul.f32 %v3635_v31, %v5051_v54 }
 0x271   : > { %3644 = vrsqrt.f32 %v943_v55  ;;  %v5077_v43 = vpop.xlane.xlu0 %972 }
 0x272   : > { %3646 = vrsqrt.f32 %v955_v22  ;;  %v2227_v28 = vsel %vm508_vm0, %v2175_v3, 0.0  ;;  %v976_v9 = vpop.xlane.xlu1 %975 }
 0x273   : > { %3648 = vrsqrt.f32 %v949_v8 }
 0x274   : > { %3650 = vrsqrt.f32 %v961_v19 }
 0x275   : > { %3652 = vrsqrt.f32 %v967_v42 }
 0x276   : > { %3654 = vrsqrt.f32 %v976_v9 }
 0x27d   : > { %v3643_v32 = vpop.eup %3642 }
 0x27e   : > { %v3645_v44 = vpop.eup %3644  ;;  %v2176_v35 = vmul.f32 %v3643_v32, %v5051_v54 }
 0x27f   : > { %2341 = vrot.lane.b32.xlu0 %v3617_v11, %s4015_s17  ;;  %v5086_v11 = vpop.xlane.xlu0 %978  ;;  %v1037_v27 = vmul.f32 0.1, %v3645_v44 }
 0x280   : > { %v2230_v24 = vsel %vm508_vm0, %v2176_v35, 0.0  ;;  %v5117_v35 = vpop.xlane.xlu1 %981 }
 0x281   : > { %2329 = vrot.lane.b32.xlu1 %v3621_v37, %s4015_s17  ;;  %v2224_v37 = vsel %vm508_vm0, %v2174_v60, 0.0  ;;  %v2037_v4 = vmul.f32 %v1639_v0, %v1037_v27 }
 0x283   : > { %2349 = vrot.lane.b32.xlu0 %v3623_v5, %s4015_s17  ;;  %v3647_v5 = vpop.eup %3646  ;;  %v985_v61 = vpop.xlane.xlu0 %984 }
 0x284   : > { %v1041_v25 = vmul.f32 0.1, %v3647_v5  ;;  %v3649_v54 = vpop.eup %3648  ;;  %3656 = vrsqrt.f32 %v985_v61  ;;  %v5129_v27 = vpop.xlane.xlu1 %987 }
 0x285   : > { %v1039_v12 = vmul.f32 0.1, %v3649_v54  ;;  %v3651_v53 = vpop.eup %3650 }
 0x286   : > { %v3653_v41 = vpop.eup %3652 }
 0x287   : > { %v2039_v18 = vmul.f32 %v1649_v13, %v1039_v12  ;;  %v1045_v58 = vmul.f32 0.1, %v3653_v41  ;;  %v3655_v2 = vpop.eup %3654 }
 0x288   : > { %v1048_v38 = vmul.f32 0.1, %v3655_v2  ;;  %v5135_v5 = vpop.permute.xlu1 %2327 }
 0x28a   : > { %v2048_v42 = vmul.f32 %v3370_v46, %v1048_v38 }
 0x28c   : > { %v2107_v57 = vmul.f32 1.442695, %v2048_v42 }
 0x2a2   : > { %2237 = vadd.xlane.f32.xlu0 %v2236_v52  ;;  %v2085_v52 = vmul.f32 1.442695, %v2037_v4 }
 0x2a5   : > { %2219 = vadd.xlane.f32.xlu1 %v2218_v62  ;;  %v5095_v62 = vpop.f32.mrf.mxu1 }
 0x2a6   : > { %2222 = vadd.xlane.f32.xlu0 %v2221_v36  ;;  %v2041_v36 = vmul.f32 %v1760_v1, %v1041_v25  ;;  %v2179_v1 = vmul.f32 %v5065_v15, %v5047_v50 }
 0x2a7   : > { %v1770_v40 = vpop.f32.mrf.mxu1 }
 0x2a8   : > { %v2093_v45 = vmul.f32 1.442695, %v2041_v36  ;;  %v2239_v36 = vsel %vm508_vm0, %v2179_v1, 0.0 }
 0x2a9   : > { %2204 = vadd.xlane.f32.xlu1 %v2203_v33  ;;  %v5099_v21 = vpop.f32.mrf.mxu1  ;;  %v2089_v33 = vmul.f32 1.442695, %v2039_v18 }
 0x2aa   : > { %2234 = vadd.xlane.f32.xlu0 %v2233_v20  ;;  %v1043_v20 = vmul.f32 0.1, %v3651_v53 }
 0x2ab   : > { %v5102_v14 = vpop.f32.mrf.mxu1 }
 0x2ac   : > { %v2043_v30 = vmul.f32 %v1770_v40, %v1043_v20  ;;  %v5154_v40 = vpop.permute.xlu0 %2325 }
 0x2ad   : > { %v5105_v8 = vpop.f32.mrf.mxu1 }
 0x2ae   : > { %v2097_v55 = vmul.f32 1.442695, %v2043_v30 }
 0x2af   : > { %v2012_v19 = vpop.f32.mrf.mxu1 }
 0x2ba   : > { %2343 = vrot.lane.b32.xlu1 %v3633_v59, %s4015_s17  ;;  %v3657_v59 = vpop.eup %3656 }
 0x2bb   : > { %v1051_v22 = vmul.f32 0.1, %v3657_v59 }
 0x2bd   : > { %v2051_v56 = vmul.f32 %v2012_v19, %v1051_v22 }
 0x2be   : > { %2351 = vrot.lane.b32.xlu1 %v3625_v29, %s4015_s17  ;;  %v2083_v29 = vmul.f32 1.442695, %v2036_v10 }
 0x2bf   : > { %v2113_v60 = vmul.f32 1.442695, %v2051_v56 }
 0x2c0   : > { %2345 = vrot.lane.b32.xlu0 %v3635_v31, %s4015_s17  ;;  %3658 = vpow2.f32 %v2083_v29  ;;  %v2045_v31 = vmul.f32 %v1881_v17, %v1045_v58 }
 0x2c1   : > { %3660 = vpow2.f32 %v2085_v52 }
 0x2c2   : > { %3662 = vpow2.f32 %v2093_v45  ;;  %v2101_v39 = vmul.f32 1.442695, %v2045_v31 }
 0x2c3   : > { %3664 = vpow2.f32 %v2089_v33 }
 0x2c4   : > { %2353 = vrot.lane.b32.xlu0 %v5065_v15, %s4015_s17  ;;  %3666 = vpow2.f32 %v2097_v55 }
 0x2c5   : > { %3668 = vpow2.f32 %v2101_v39 }
 0x2c6   : > { %3670 = vpow2.f32 %v2107_v57  ;;  %v3099_v57 = vld [vmem:[%s5021_s12 + $0x4] ss:$0 sm:$0xff] }
 0x2c7   : > { %3672 = vpow2.f32 %v2113_v60 }
 0x2c8   : > { %3674 = vrsqrt.f32 %v5069_v63 }
 0x2c9   : > { %3676 = vrsqrt.f32 %v5073_v49  ;;  %v2336_v49 = vpop.permute.xlu1 %2335 }
 0x2ca   : > { %v2436_v15 = vsel %vm508_vm0, %v2336_v49, 0.0 }
 0x2cd   : > { %v3659_v34 = vpop.eup %3658  ;;  %v5145_v54 = vpop.xlane.xlu1 %2201 }
 0x2ce   : > { %v5107_v47 = vpop.eup %3660 }
 0x2d1   : > { %v5152_v12 = vpop.xlane.xlu1 %2213 }
 0x2e2   : > { %2225 = vadd.xlane.f32.xlu1 %v2224_v37 }
 0x2e3   : > { %2231 = vadd.xlane.f32.xlu0 %v2230_v24 }
 0x2e7   : > { %2228 = vadd.xlane.f32.xlu0 %v2227_v28  ;;  %v2180_v28 = vmul.f32 %v3659_v34, %v5047_v50 }
 0x2e9   : > { %v2242_v9 = vsel %vm508_vm0, %v2180_v28, 0.0 }
 0x2f3   : > { %2347 = vrot.lane.b32.xlu1 %v3643_v32, %s4015_s17  ;;  %v5111_v32 = vpop.eup %3662 }
 0x2f4   : > { %v5115_v44 = vpop.eup %3664 }
 0x2f5   : > { %v5121_v3 = vpop.eup %3666 }
 0x2f6   : > { %v5126_v10 = vpop.eup %3668 }
 0x2f7   : > { %2355 = vrot.lane.b32.xlu1 %v3659_v34, %s4015_s17  ;;  %v5133_v37 = vpop.eup %3670 }
 0x2f8   : > { %v5139_v63 = vpop.eup %3672 }
 0x2f9   : > { %v3675_v24 = vpop.eup %3674 }
 0x2fa   : > { %v1038_v0 = vmul.f32 0.1, %v3675_v24  ;;  %v3677_v29 = vpop.eup %3676 }
 0x2fb   : > { %v1042_v25 = vmul.f32 0.1, %v3677_v29 }
 0x2fc   : > { %v2038_v4 = vmul.f32 %v5083_v6, %v1038_v0  ;;  %v2332_v6 = vpop.permute.xlu1 %2331 }
 0x2fd   : > { %2357 = vrot.lane.b32.xlu0 %v5107_v47, %s4015_s17  ;;  %v2042_v52 = vmul.f32 %v5089_v51, %v1042_v25  ;;  %v2334_v51 = vpop.permute.xlu0 %2333  ;;  %v2430_v58 = vsel %vm508_vm0, %v2332_v6, 0.0 }
 0x2fe   : > { %v2087_v61 = vmul.f32 1.442695, %v2038_v4  ;;  %v2433_v41 = vsel %vm508_vm0, %v2334_v51, 0.0 }
 0x2ff   : > { %v2095_v53 = vmul.f32 1.442695, %v2042_v52 }
 0x300   : > { %3678 = vpow2.f32 %v2087_v61  ;;  %v2340_v13 = vpop.permute.xlu1 %2339 }
 0x301   : > { %2365 = vrot.lane.b32.xlu0 %v5111_v32, %s4015_s17  ;;  %3680 = vpow2.f32 %v2095_v53  ;;  %v5168_v30 = vpop.xlane.xlu0 %2198  ;;  %v2442_v2 = vsel %vm508_vm0, %v2340_v13, 0.0 }
 0x302   : > { %3682 = vrsqrt.f32 %v5071_v48 }
 0x303   : > { %3684 = vrsqrt.f32 %v5075_v16 }
 0x304   : > { %v5156_v18 = vpop.xlane.xlu1 %2210 }
 0x305   : > { %2361 = vrot.lane.b32.xlu0 %v5115_v44, %s4015_s17  ;;  %v2338_v59 = vpop.permute.xlu0 %2337 }
 0x306   : > { %v2439_v38 = vsel %vm508_vm0, %v2338_v59, 0.0  ;;  %v5211_v59 = vld [vmem:[%s5021_s12 + $0x5] ss:$0 sm:$0xff] }
 0x308   : > { %v2330_v20 = vpop.permute.xlu1 %2329 }
 0x309   : > { %2369 = vrot.lane.b32.xlu0 %v5121_v3, %s4015_s17  ;;  %v2427_v31 = vsel %vm508_vm0, %v2330_v20, 0.0  ;;  %v5176_v55 = vpop.xlane.xlu0 %2207 }
 0x30d   : > { %2373 = vrot.lane.b32.xlu0 %v5126_v10, %s4015_s17  ;;  %v3679_v45 = vpop.eup %3678  ;;  %v5180_v39 = vpop.xlane.xlu0 %2216 }
 0x30e   : > { %v5159_v50 = vpop.eup %3680  ;;  %v2182_v49 = vmul.f32 %v3679_v45, %v3099_v57 }
 0x30f   : > { %v3683_v46 = vpop.eup %3682 }
 0x310   : > { %v1040_v19 = vmul.f32 0.1, %v3683_v46  ;;  %v3685_v42 = vpop.eup %3684 }
 0x311   : > { %2379 = vrot.lane.b32.xlu0 %v5133_v37, %s4015_s17  ;;  %v2342_v56 = vpop.permute.xlu0 %2341  ;;  %v1044_v24 = vmul.f32 0.1, %v3685_v42 }
 0x312   : > { %v2040_v60 = vmul.f32 %v5093_v7, %v1040_v19  ;;  %v2445_v0 = vsel %vm508_vm0, %v2342_v56, 0.0 }
 0x313   : > { %v2044_v4 = vmul.f32 %v5095_v62, %v1044_v24 }
 0x314   : > { %v2091_v29 = vmul.f32 1.442695, %v2040_v60 }
 0x315   : > { %2385 = vrot.lane.b32.xlu0 %v5139_v63, %s4015_s17  ;;  %v2350_v28 = vpop.permute.xlu0 %2349  ;;  %v2099_v1 = vmul.f32 1.442695, %v2044_v4 }
 0x316   : > { %v2457_v25 = vsel %vm508_vm0, %v2350_v28, 0.0  ;;  %3686 = vpow2.f32 %v2091_v29  ;;  %v1891_v29 = vpop.f32.mrf.mxu0 }
 0x317   : > { %3688 = vpow2.f32 %v2099_v1 }
 0x318   : > { %3690 = vrsqrt.f32 %v5081_v26 }
 0x319   : > { %3692 = vrsqrt.f32 %v5117_v35 }
 0x31a   : > { %3694 = vrsqrt.f32 %v5086_v11 }
 0x31b   : > { %2243 = vadd.xlane.f32.xlu1 %v2242_v9  ;;  %v2248_v9 = vsel %vm508_vm0, %v2182_v49, 0.0  ;;  %3696 = vrsqrt.f32 %v5129_v27 }
 0x31c   : > { %3698 = vrsqrt.f32 %v5077_v43 }
 0x31f   : > { %2240 = vadd.xlane.f32.xlu1 %v2239_v36 }
 0x323   : > { %v3687_v7 = vpop.eup %3686 }
 0x324   : > { %v5196_v53 = vpop.eup %3688 }
 0x32b   : > { %v5189_v61 = vpop.xlane.xlu0 %2237 }
 0x32e   : > { %v5165_v33 = vpop.xlane.xlu1 %2219 }
 0x32f   : > { %v5191_v52 = vpop.xlane.xlu0 %2222 }
 0x330   : > { %2359 = vrot.lane.b32.xlu1 %v3679_v45, %s4015_s17 }
 0x332   : > { %v5172_v17 = vpop.xlane.xlu1 %2204 }
 0x333   : > { %v5200_v62 = vpop.xlane.xlu0 %2234 }
 0x334   : > { %2367 = vrot.lane.b32.xlu1 %v5159_v50, %s4015_s17  ;;  %2437 = vadd.xlane.f32.xlu0 %v2436_v15 }
 0x336   : > { %v2344_v34 = vpop.permute.xlu1 %2343 }
 0x337   : > { %v2448_v48 = vsel %vm508_vm0, %v2344_v34, 0.0  ;;  %v2346_v45 = vpop.permute.xlu0 %2345  ;;  %v2185_v34 = vmul.f32 %v5111_v32, %v5211_v59 }
 0x338   : > { %2434 = vadd.xlane.f32.xlu0 %v2433_v41  ;;  %v2451_v20 = vsel %vm508_vm0, %v2346_v45, 0.0 }
 0x339   : > { %v2257_v35 = vsel %vm508_vm0, %v2185_v34, 0.0 }
 0x33a   : > { %v2352_v22 = vpop.permute.xlu1 %2351 }
 0x33b   : > { %v2460_v16 = vsel %vm508_vm0, %v2352_v22, 0.0  ;;  %v2354_v41 = vpop.permute.xlu0 %2353  ;;  %v2183_v22 = vmul.f32 %v5115_v44, %v3099_v57 }
 0x33c   : > { %2431 = vadd.xlane.f32.xlu0 %v2430_v58  ;;  %v2463_v58 = vsel %vm508_vm0, %v2354_v41, 0.0 }
 0x33d   : > { %v2251_v43 = vsel %vm508_vm0, %v2183_v22, 0.0 }
 0x340   : > { %2443 = vadd.xlane.f32.xlu0 %v2442_v2  ;;  %v2181_v2 = vmul.f32 %v5107_v47, %v3099_v57 }
 0x344   : > { %2428 = vadd.xlane.f32.xlu0 %v2427_v31  ;;  %v2245_v31 = vsel %vm508_vm0, %v2181_v2, 0.0 }
 0x348   : > { %2440 = vadd.xlane.f32.xlu0 %v2439_v38  ;;  %v3691_v38 = vpop.eup %3690 }
 0x349   : > { %v1046_v26 = vmul.f32 0.1, %v3691_v38  ;;  %v3693_v11 = vpop.eup %3692  ;;  %v2424_v38 = vsel %vm508_vm0, %v5135_v5, 0.0  ;;  %v2187_v5 = vmul.f32 %v5121_v3, %v5211_v59 }
 0x34a   : > { %v1050_v46 = vmul.f32 0.1, %v3693_v11  ;;  %v3695_v19 = vpop.eup %3694  ;;  %v2186_v11 = vmul.f32 %v5159_v50, %v5211_v59  ;;  %v2188_v50 = vmul.f32 %v5196_v53, %v5211_v59 }
 0x34b   : > { %v2046_v47 = vmul.f32 %v5097_v23, %v1046_v26  ;;  %v1049_v42 = vmul.f32 0.1, %v3695_v19  ;;  %v3697_v56 = vpop.eup %3696 }
 0x34c   : > { %2449 = vadd.xlane.f32.xlu0 %v2448_v48  ;;  %v2184_v48 = vmul.f32 %v3687_v7, %v3099_v57  ;;  %v1052_v23 = vmul.f32 0.1, %v3697_v56 }
 0x34d   : > { %v2103_v32 = vmul.f32 1.442695, %v2046_v47  ;;  %v2049_v24 = vmul.f32 %v5102_v14, %v1049_v42  ;;  %v3101_v42 = vld [vmem:[%s5021_s12 + $0x6] ss:$0 sm:$0xff] }
 0x34e   : > { %v2254_v27 = vsel %vm508_vm0, %v2184_v48, 0.0  ;;  %v2052_v44 = vmul.f32 %v5105_v8, %v1052_v23  ;;  %v2189_v3 = vmul.f32 %v5126_v10, %v3101_v42  ;;  %v2192_v10 = vmul.f32 %v5133_v37, %v3101_v42 }
 0x34f   : > { %3700 = vpow2.f32 %v2103_v32  ;;  %v2109_v49 = vmul.f32 1.442695, %v2049_v24 }
 0x350   : > { %2461 = vadd.xlane.f32.xlu0 %v2460_v16  ;;  %v2050_v16 = vmul.f32 %v5099_v21, %v1050_v46  ;;  %v2115_v4 = vmul.f32 1.442695, %v2052_v44  ;;  %v2269_v24 = vsel %vm508_vm0, %v2189_v3, 0.0  ;;  %v3102_v44 = vld [vmem:[%s5021_s12 + $0x7] ss:$0 sm:$0xff] }
 0x352   : > { %v2111_v60 = vmul.f32 1.442695, %v2050_v16 }
 0x354   : > { %2446 = vadd.xlane.f32.xlu0 %v2445_v0  ;;  %v3699_v0 = vpop.eup %3698  ;;  %3702 = vpow2.f32 %v2111_v60 }
 0x355   : > { %v1047_v57 = vmul.f32 0.1, %v3699_v0  ;;  %3704 = vpow2.f32 %v2109_v49 }
 0x356   : > { %3706 = vpow2.f32 %v2115_v4 }
 0x358   : > { %2249 = vadd.xlane.f32.xlu1 %v2248_v9  ;;  %2458 = vadd.xlane.f32.xlu0 %v2457_v25  ;;  %v2047_v25 = vmul.f32 %v1891_v29, %v1047_v57  ;;  %v2278_v57 = vsel %vm508_vm0, %v2192_v10, 0.0 }
 0x35a   : > { %v2105_v1 = vmul.f32 1.442695, %v2047_v25 }
 0x35c   : > { %3708 = vpow2.f32 %v2105_v1 }
 0x35d   : > { %3710 = vrcp.f32 %v5172_v17 }
 0x35e   : > { %3712 = vrcp.f32 %v5176_v55 }
 0x35f   : > { %3714 = vrcp.f32 %v5156_v18 }
 0x360   : > { %3716 = vrcp.f32 %v5145_v54 }
 0x361   : > { %3718 = vrcp.f32 %v5152_v12 }
 0x362   : > { %3720 = vrcp.f32 %v5180_v39 }
 0x363   : > { %3722 = vrcp.f32 %v5168_v30 }
 0x364   : > { %3724 = vrcp.f32 %v5165_v33 }
 0x365   : > { %3726 = vrcp.f32 %v5191_v52 }
 0x369   : > { %2363 = vrot.lane.b32.xlu1 %v3687_v7, %s4015_s17 }
 0x36b   : > { %v5194_v36 = vpop.xlane.xlu1 %2225 }
 0x36c   : > { %v5228_v21 = vpop.xlane.xlu0 %2231  ;;  %3728 = vrcp.f32 %v5194_v36 }
 0x36d   : > { %2371 = vrot.lane.b32.xlu1 %v5196_v53, %s4015_s17 }
 0x36f   : > { %v2348_v6 = vpop.permute.xlu1 %2347 }
 0x370   : > { %v2454_v13 = vsel %vm508_vm0, %v2348_v6, 0.0  ;;  %v5232_v14 = vpop.xlane.xlu0 %2228  ;;  %v3701_v6 = vpop.eup %3700 }
 0x371   : > { %2455 = vadd.xlane.f32.xlu0 %v2454_v13  ;;  %v3703_v45 = vpop.eup %3702  ;;  %v2190_v23 = vmul.f32 %v3701_v6, %v3101_v42  ;;  %3730 = vrcp.f32 %v5232_v14 }
 0x372   : > { %v2194_v25 = vmul.f32 %v3703_v45, %v3102_v44  ;;  %3732 = vrcp.f32 %v5189_v61 }
 0x373   : > { %v2356_v15 = vpop.permute.xlu1 %2355  ;;  %v2272_v59 = vsel %vm508_vm0, %v2190_v23, 0.0  ;;  %3734 = vrcp.f32 %v5228_v21 }
 0x374   : > { %v2466_v51 = vsel %vm508_vm0, %v2356_v15, 0.0  ;;  %v2284_v1 = vsel %vm508_vm0, %v2194_v25, 0.0 }
 0x375   : > { %2467 = vadd.xlane.f32.xlu0 %v2466_v51  ;;  %v2358_v51 = vpop.permute.xlu0 %2357 }
 0x376   : > { %v2469_v41 = vsel %vm508_vm0, %v2358_v51, 0.0 }
 0x379   : > { %2452 = vadd.xlane.f32.xlu0 %v2451_v20  ;;  %v3705_v20 = vpop.eup %3704  ;;  %3736 = vrcp.f32 %v5200_v62 }
 0x37a   : > { %v3707_v2 = vpop.eup %3706  ;;  %v2193_v29 = vmul.f32 %v3705_v20, %v3102_v44 }
 0x37b   : > { %v3709_v34 = vpop.eup %3708 }
 0x37c   : > { %v2191_v0 = vmul.f32 %v3709_v34, %v3101_v42  ;;  %v2281_v4 = vsel %vm508_vm0, %v2193_v29, 0.0  ;;  %v3711_v23 = vpop.eup %3710 }
 0x37d   : > { %2464 = vadd.xlane.f32.xlu0 %v2463_v58  ;;  %v2366_v58 = vpop.permute.xlu0 %2365  ;;  %v3713_v18 = vpop.eup %3712 }
 0x37e   : > { %v2275_v49 = vsel %vm508_vm0, %v2191_v0, 0.0  ;;  %v3715_v12 = vpop.eup %3714 }
 0x37f   : > { %v3717_v39 = vpop.eup %3716 }
 0x380   : > { %v3719_v52 = vpop.eup %3718 }
 0x381   : > { %v2362_v46 = vpop.permute.xlu0 %2361  ;;  %v3721_v10 = vpop.eup %3720 }
 0x382   : > { %v2475_v22 = vsel %vm508_vm0, %v2362_v46, 0.0  ;;  %v3723_v14 = vpop.eup %3722 }
 0x383   : > { %v3725_v25 = vpop.eup %3724 }
 0x385   : > { %v2370_v16 = vpop.permute.xlu0 %2369 }
 0x386   : > { %v2487_v56 = vsel %vm508_vm0, %v2370_v16, 0.0 }
 0x389   : > { %v2374_v60 = vpop.permute.xlu0 %2373 }
 0x38a   : > { %v2493_v53 = vsel %vm508_vm0, %v2374_v60, 0.0 }
 0x38d   : > { %v2380_v37 = vpop.permute.xlu0 %2379 }
 0x391   : > { %2246 = vadd.xlane.f32.xlu1 %v2245_v31  ;;  %v2481_v31 = vsel %vm508_vm0, %v2366_v58, 0.0 }
 0x395   : > { %2258 = vadd.xlane.f32.xlu1 %v2257_v35  ;;  %v2421_v35 = vsel %vm508_vm0, %v5154_v40, 0.0  ;;  %v2263_v40 = vsel %vm508_vm0, %v2187_v5, 0.0 }
 0x399   : > { %2255 = vadd.xlane.f32.xlu1 %v2254_v27  ;;  %v2260_v27 = vsel %vm508_vm0, %v2186_v11, 0.0 }
 0x39d   : > { %2252 = vadd.xlane.f32.xlu1 %v2251_v43  ;;  %v2266_v43 = vsel %vm508_vm0, %v2188_v50, 0.0 }
 0x3a4   : > { %v5226_v28 = vpop.xlane.xlu1 %2243 }
 0x3a5   : > { %3738 = vrcp.f32 %v5226_v28 }
 0x3a8   : > { %v5230_v9 = vpop.xlane.xlu1 %2240 }
 0x3ac   : > { %v2360_v7 = vpop.permute.xlu1 %2359 }
 0x3ad   : > { %v2472_v13 = vsel %vm508_vm0, %v2360_v7, 0.0  ;;  %v2195_v7 = vmul.f32 %v5139_v63, %v3102_v44 }
 0x3ae   : > { %2375 = vrot.lane.b32.xlu1 %v3701_v6, %s4015_s17  ;;  %2473 = vadd.xlane.f32.xlu0 %v2472_v13  ;;  %v2196_v13 = vmul.f32 %v3707_v2, %v3102_v44 }
 0x3af   : > { %v2287_v6 = vsel %vm508_vm0, %v2195_v7, 0.0  ;;  %v3727_v7 = vpop.eup %3726 }
 0x3b0   : > { %v2368_v8 = vpop.permute.xlu1 %2367 }
 0x3b1   : > { %v2484_v15 = vsel %vm508_vm0, %v2368_v8, 0.0  ;;  %v2290_v8 = vsel %vm508_vm0, %v2196_v13, 0.0 }
 0x3b2   : > { %2383 = vrot.lane.b32.xlu1 %v3703_v45, %s4015_s17  ;;  %2485 = vadd.xlane.f32.xlu0 %v2484_v15  ;;  %v2386_v15 = vpop.permute.xlu0 %2385 }
 0x3b3   : > { %v2511_v16 = vsel %vm508_vm0, %v2386_v15, 0.0 }
 0x3b6   : > { %2381 = vrot.lane.b32.xlu1 %v3705_v20, %s4015_s17  ;;  %2470 = vadd.xlane.f32.xlu0 %v2469_v41 }
 0x3ba   : > { %2387 = vrot.lane.b32.xlu1 %v3707_v2, %s4015_s17  ;;  %2482 = vadd.xlane.f32.xlu0 %v2481_v31 }
 0x3bd   : > { %v5276_v51 = vpop.xlane.xlu0 %2437 }
 0x3be   : > { %2377 = vrot.lane.b32.xlu1 %v3709_v34, %s4015_s17  ;;  %v2554_v36 = vmul.f32 %v3719_v52, %v5276_v51 }
 0x3c1   : > { %v2435_v41 = vpop.xlane.xlu0 %2434 }
 0x3c2   : > { %v2553_v30 = vmul.f32 %v3715_v12, %v2435_v41 }
 0x3c5   : > { %v2432_v63 = vpop.xlane.xlu0 %2431 }
 0x3c9   : > { %v5286_v2 = vpop.xlane.xlu0 %2443 }
 0x3ca   : > { %v2556_v62 = vmul.f32 %v3725_v25, %v5286_v2 }
 0x3cd   : > { %v2429_v11 = vpop.xlane.xlu0 %2428 }
 0x3ce   : > { %v2551_v55 = vmul.f32 %v3711_v23, %v2429_v11 }
 0x3d0   : > { %v2583_v33 = vadd.f32 1.0, %v2551_v55 }
 0x3d1   : > { %v2441_v5 = vpop.xlane.xlu0 %2440 }
 0x3d2   : > { %3740 = vlog2.f32 %v2583_v33  ;;  %v2555_v61 = vmul.f32 %v3721_v10, %v2441_v5 }
 0x3d4   : > { %v2587_v28 = vadd.f32 1.0, %v2555_v61  ;;  %v3104_v61 = vld [vmem:[%s5348_s13 + $0x1] ss:$0 sm:$0xff] }
 0x3d5   : > { %v5293_v50 = vpop.xlane.xlu0 %2449 }
 0x3d9   : > { %v5297_v42 = vpop.xlane.xlu0 %2461 }
 0x3e1   : > { %v5245_v26 = vpop.xlane.xlu1 %2249 }
 0x3e2   : > { %2425 = vadd.xlane.f32.xlu1 %v2424_v38 }
 0x3e5   : > { %v2364_v48 = vpop.permute.xlu1 %2363 }
 0x3e6   : > { %v2478_v47 = vsel %vm508_vm0, %v2364_v48, 0.0  ;;  %2422 = vadd.xlane.f32.xlu1 %v2421_v35  ;;  %v2502_v48 = vsel %vm508_vm0, %v2380_v37, 0.0  ;;  %v3729_v37 = vpop.eup %3728 }
 0x3e7   : > { %2479 = vadd.xlane.f32.xlu0 %v2478_v47  ;;  %v2558_v15 = vmul.f32 %v3729_v37, %v5293_v50 }
 0x3e9   : > { %v2372_v19 = vpop.permute.xlu1 %2371 }
 0x3ea   : > { %2261 = vadd.xlane.f32.xlu1 %v2260_v27  ;;  %v2490_v32 = vsel %vm508_vm0, %v2372_v19, 0.0 }
 0x3eb   : > { %2476 = vadd.xlane.f32.xlu0 %v2475_v22 }
 0x3ee   : > { %2264 = vadd.xlane.f32.xlu1 %v2263_v40 }
 0x3ef   : > { %2491 = vadd.xlane.f32.xlu0 %v2490_v32 }
 0x3f2   : > { %2267 = vadd.xlane.f32.xlu1 %v2266_v43  ;;  %v2447_v43 = vpop.xlane.xlu0 %2446 }
 0x3f3   : > { %2488 = vadd.xlane.f32.xlu0 %v2487_v56  ;;  %v2557_v13 = vmul.f32 %v3727_v7, %v2447_v43 }
 0x3f6   : > { %2270 = vadd.xlane.f32.xlu1 %v2269_v24  ;;  %v5299_v3 = vpop.xlane.xlu0 %2458 }
 0x3f7   : > { %2494 = vadd.xlane.f32.xlu0 %v2493_v53  ;;  %v2552_v53 = vmul.f32 %v3713_v18, %v2432_v63  ;;  %v3731_v63 = vpop.eup %3730 }
 0x3f8   : > { %v3733_v2 = vpop.eup %3732 }
 0x3fa   : > { %2273 = vadd.xlane.f32.xlu1 %v2272_v59  ;;  %v5301_v56 = vpop.xlane.xlu0 %2455 }
 0x3fe   : > { %2276 = vadd.xlane.f32.xlu1 %v2275_v49  ;;  %v5304_v60 = vpop.xlane.xlu0 %2467  ;;  %v2584_v49 = vadd.f32 1.0, %v2552_v53 }
 0x402   : > { %2279 = vadd.xlane.f32.xlu1 %v2278_v57  ;;  %v2453_v24 = vpop.xlane.xlu0 %2452  ;;  %v2585_v57 = vadd.f32 1.0, %v2553_v30 }
 0x406   : > { %2282 = vadd.xlane.f32.xlu1 %v2281_v4  ;;  %v5314_v17 = vpop.xlane.xlu0 %2464 }
 0x40a   : > { %2285 = vadd.xlane.f32.xlu1 %v2284_v1  ;;  %v2586_v1 = vadd.f32 1.0, %v2554_v36 }
 0x40e   : > { %2288 = vadd.xlane.f32.xlu1 %v2287_v6 }
 0x412   : > { %2291 = vadd.xlane.f32.xlu1 %v2290_v8  ;;  %v2588_v8 = vadd.f32 1.0, %v2556_v62 }
 0x41a   : > { %v5278_v20 = vpop.xlane.xlu1 %2246 }
 0x41e   : > { %v5280_v45 = vpop.xlane.xlu1 %2258 }
 0x422   : > { %v5282_v58 = vpop.xlane.xlu1 %2255 }
 0x426   : > { %v5284_v31 = vpop.xlane.xlu1 %2252 }
 0x42a   : > { %v2376_v34 = vpop.permute.xlu1 %2375 }
 0x42b   : > { %v2496_v38 = vsel %vm508_vm0, %v2376_v34, 0.0  ;;  %v2589_v34 = vadd.f32 1.0, %v2557_v13 }
 0x42c   : > { %2497 = vadd.xlane.f32.xlu1 %v2496_v38  ;;  %v3735_v38 = vpop.eup %3734 }
 0x42d   : > { %v2560_v11 = vmul.f32 %v3735_v38, %v5301_v56 }
 0x42e   : > { %v2384_v35 = vpop.permute.xlu1 %2383 }
 0x42f   : > { %v2508_v46 = vsel %vm508_vm0, %v2384_v35, 0.0  ;;  %v2590_v35 = vadd.f32 1.0, %v2558_v15  ;;  %v2592_v50 = vadd.f32 1.0, %v2560_v11 }
 0x430   : > { %2503 = vadd.xlane.f32.xlu1 %v2502_v48  ;;  %v3737_v48 = vpop.eup %3736 }
 0x431   : > { %v2561_v5 = vmul.f32 %v3737_v48, %v5299_v3 }
 0x432   : > { %v2382_v47 = vpop.permute.xlu1 %2381 }
 0x433   : > { %v2505_v32 = vsel %vm508_vm0, %v2382_v47, 0.0  ;;  %v3739_v47 = vpop.eup %3738 }
 0x434   : > { %2509 = vadd.xlane.f32.xlu1 %v2508_v46  ;;  %v2564_v53 = vmul.f32 %v3739_v47, %v5304_v60 }
 0x436   : > { %v2388_v27 = vpop.permute.xlu1 %2387  ;;  %v2596_v60 = vadd.f32 1.0, %v2564_v53 }
 0x437   : > { %v2514_v22 = vsel %vm508_vm0, %v2388_v27, 0.0  ;;  %v5317_v54 = vpop.xlane.xlu0 %2473  ;;  %v3741_v27 = vpop.eup %3740 }
 0x438   : > { %2515 = vadd.xlane.f32.xlu1 %v2514_v22 }
 0x43a   : > { %v2378_v19 = vpop.permute.xlu1 %2377 }
 0x43b   : > { %v2499_v40 = vsel %vm508_vm0, %v2378_v19, 0.0  ;;  %v5325_v29 = vpop.xlane.xlu0 %2485  ;;  %v2562_v19 = vmul.f32 %v3733_v2, %v5297_v42 }
 0x43c   : > { %2500 = vadd.xlane.f32.xlu0 %v2499_v40 }
 0x43d   : > { %v2594_v55 = vadd.f32 1.0, %v2562_v19 }
 0x43f   : > { %v2471_v51 = vpop.xlane.xlu0 %2470 }
 0x440   : > { %2506 = vadd.xlane.f32.xlu0 %v2505_v32 }
 0x443   : > { %v5336_v46 = vpop.xlane.xlu0 %2482 }
 0x444   : > { %2512 = vadd.xlane.f32.xlu0 %v2511_v16  ;;  %v2618_v16 = vmul.f32 0.6931472, %v3741_v27 }
 0x46b   : > { %v2426_v59 = vpop.xlane.xlu1 %2425 }
 0x46c   : > { %v2550_v0 = vmul.f32 %v3717_v39, %v2426_v59 }
 0x46e   : > { %v2582_v44 = vadd.f32 1.0, %v2550_v0 }
 0x46f   : > { %v2423_v4 = vpop.xlane.xlu1 %2422 }
 0x470   : > { %3742 = vlog2.f32 %v2582_v44  ;;  %v2549_v21 = vmul.f32 %v3723_v14, %v2423_v4  ;;  %v2480_v43 = vpop.xlane.xlu0 %2479 }
 0x471   : > { %3744 = vlog2.f32 %v2584_v49 }
 0x472   : > { %3746 = vrcp.f32 %v5230_v9  ;;  %v2581_v6 = vadd.f32 1.0, %v2549_v21  ;;  %v2559_v9 = vmul.f32 %v3731_v63, %v2453_v24  ;;  %v3103_v24 = vld [vmem:[%s5348_s13] ss:$0 sm:$0xff] }
 0x473   : > { %3748 = vlog2.f32 %v2585_v57  ;;  %v5330_v41 = vpop.xlane.xlu1 %2261  ;;  %v2727_v59 = vmul.f32 %v3103_v24, %v2618_v16 }
 0x474   : > { %3750 = vlog2.f32 %v2581_v6  ;;  %v2477_v14 = vpop.xlane.xlu0 %2476 }
 0x475   : > { %3752 = vlog2.f32 %v2586_v1  ;;  %v2761_v37 = vsel %vm2757_vm1, %v2727_v59, 0.0 }
 0x476   : > { %3754 = vrcp.f32 %v5278_v20 }
 0x477   : > { %3756 = vlog2.f32 %v2587_v28  ;;  %v5338_v20 = vpop.xlane.xlu1 %2264 }
 0x478   : > { %3758 = vrcp.f32 %v5245_v26  ;;  %v2591_v26 = vadd.f32 1.0, %v2559_v9 }
 0x479   : > { %3760 = vlog2.f32 %v2588_v8 }
 0x47a   : > { %3762 = vrcp.f32 %v5284_v31 }
 0x47b   : > { %3764 = vlog2.f32 %v2589_v34 }
 0x47c   : > { %3766 = vrcp.f32 %v5282_v58  ;;  %v2593_v58 = vadd.f32 1.0, %v2561_v5 }
 0x47d   : > { %v3743_v22 = vpop.eup %3742  ;;  %3768 = vlog2.f32 %v2590_v35 }
 0x47e   : > { %v3745_v40 = vpop.eup %3744  ;;  %3770 = vrcp.f32 %v5280_v45  ;;  %v2616_v31 = vmul.f32 0.6931472, %v3743_v22  ;;  %v5352_v45 = vpop.xlane.xlu1 %2267 }
 0x47f   : > { %v3747_v32 = vpop.eup %3746  ;;  %3772 = vlog2.f32 %v2591_v26  ;;  %v2620_v23 = vmul.f32 0.6931472, %v3745_v40 }
 0x480   : > { %v3749_v56 = vpop.eup %3748  ;;  %v2563_v3 = vmul.f32 %v3747_v32, %v5314_v17  ;;  %3774 = vlog2.f32 %v2592_v50  ;;  %v2726_v12 = vmul.f32 %v3103_v24, %v2616_v31 }
 0x481   : > { %v3751_v42 = vpop.eup %3750  ;;  %v2622_v33 = vmul.f32 0.6931472, %v3749_v56  ;;  %3776 = vlog2.f32 %v2593_v58  ;;  %v2728_v44 = vmul.f32 %v3103_v24, %v2620_v23 }
 0x482   : > { %v3753_v18 = vpop.eup %3752  ;;  %v2614_v39 = vmul.f32 0.6931472, %v3751_v42  ;;  %v2595_v0 = vadd.f32 1.0, %v2563_v3  ;;  %3778 = vlog2.f32 %v2594_v55  ;;  %v2759_v25 = vsel %vm2757_vm1, %v2726_v12, 0.0  ;;  %v5359_v28 = vpop.xlane.xlu1 %2270  ;;  %v3105_v3 = vld [vmem:[%s5348_s13 + $0x2] ss:$0 sm:$0xff] }
 0x483   : > { %v3755_v30 = vpop.eup %3754  ;;  %v2624_v10 = vmul.f32 0.6931472, %v3753_v18  ;;  %v2729_v62 = vmul.f32 %v3104_v61, %v2622_v33 }
 0x484   : > { %v3757_v52 = vpop.eup %3756  ;;  %v2565_v17 = vmul.f32 %v3755_v30, %v2471_v51  ;;  %v2725_v36 = vmul.f32 %v3103_v24, %v2614_v39  ;;  %3780 = vlog2.f32 %v2595_v0 }
 0x485   : > { %v3759_v49 = vpop.eup %3758  ;;  %v2626_v7 = vmul.f32 0.6931472, %v3757_v52  ;;  %v2730_v63 = vmul.f32 %v3104_v61, %v2624_v10  ;;  %3782 = vlog2.f32 %v2596_v60  ;;  %v2765_v11 = vsel %vm2757_vm1, %v2729_v62, 0.0 }
 0x486   : > { %v3761_v57 = vpop.eup %3760  ;;  %v2566_v4 = vmul.f32 %v3759_v49, %v5317_v54  ;;  %v2758_v21 = vsel %vm2757_vm1, %v2725_v36, 0.0  ;;  %v2597_v8 = vadd.f32 1.0, %v2565_v17  ;;  %v2763_v54 = vsel %vm2757_vm1, %v2728_v44, 0.0  ;;  %v5366_v31 = vpop.xlane.xlu1 %2273 }
 0x487   : > { %v3763_v1 = vpop.eup %3762  ;;  %v2760_v6 = vadd.f32 %v2759_v25, %v2758_v21  ;;  %v2628_v9 = vmul.f32 0.6931472, %v3761_v57  ;;  %v2731_v47 = vmul.f32 %v3104_v61, %v2626_v7  ;;  %v2767_v40 = vsel %vm2757_vm1, %v2730_v63, 0.0 }
 0x488   : > { %v3765_v13 = vpop.eup %3764  ;;  %v2567_v15 = vmul.f32 %v3763_v1, %v2477_v14  ;;  %v2598_v38 = vadd.f32 1.0, %v2566_v4  ;;  %3784 = vlog2.f32 %v2597_v8 }
 0x489   : > { %v3767_v51 = vpop.eup %3766  ;;  %v2762_v34 = vadd.f32 %v2761_v37, %v2760_v6  ;;  %v2630_v5 = vmul.f32 0.6931472, %v3765_v13  ;;  %v2732_v32 = vmul.f32 %v3104_v61, %v2628_v9  ;;  %v2769_v58 = vsel %vm2757_vm1, %v2731_v47, 0.0  ;;  %v3106_v61 = vld [vmem:[%s5348_s13 + $0x3] ss:$0 sm:$0xff] }
 0x48a   : > { %v3769_v2 = vpop.eup %3768  ;;  %v2568_v35 = vmul.f32 %v3767_v51, %v2480_v43  ;;  %v2599_v22 = vadd.f32 1.0, %v2567_v15  ;;  %3786 = vlog2.f32 %v2598_v38  ;;  %v5371_v59 = vpop.xlane.xlu1 %2276 }
 0x48b   : > { %v3771_v48 = vpop.eup %3770  ;;  %v2764_v27 = vadd.f32 %v2763_v54, %v2762_v34  ;;  %v2632_v16 = vmul.f32 0.6931472, %v3769_v2  ;;  %v2733_v24 = vmul.f32 %v3105_v3, %v2630_v5  ;;  %v2771_v12 = vsel %vm2757_vm1, %v2732_v32, 0.0 }
 0x48c   : > { %v2569_v26 = vmul.f32 %v3771_v48, %v5336_v46  ;;  %v3773_v19 = vpop.eup %3772  ;;  %v2600_v43 = vadd.f32 1.0, %v2568_v35  ;;  %3788 = vlog2.f32 %v2599_v22 }
 0x48d   : > { %v2766_v50 = vadd.f32 %v2765_v11, %v2764_v27  ;;  %v3775_v56 = vpop.eup %3774  ;;  %v2634_v23 = vmul.f32 0.6931472, %v3773_v19  ;;  %v2734_v39 = vmul.f32 %v3105_v3, %v2632_v16  ;;  %v2773_v52 = vsel %vm2757_vm1, %v2733_v24, 0.0  ;;  %v3107_v11 = vld [vmem:[%s5348_s13 + $0x4] ss:$0 sm:$0xff] }
 0x48e   : > { %v2601_v55 = vadd.f32 1.0, %v2569_v26  ;;  %v3777_v46 = vpop.eup %3776  ;;  %v2636_v30 = vmul.f32 0.6931472, %v3775_v56  ;;  %3790 = vlog2.f32 %v2600_v43  ;;  %v2280_v7 = vpop.xlane.xlu1 %2279 }
 0x48f   : > { %v2768_v42 = vadd.f32 %v2767_v40, %v2766_v50  ;;  %v3779_v53 = vpop.eup %3778  ;;  %v2638_v0 = vmul.f32 0.6931472, %v3777_v46  ;;  %v2735_v17 = vmul.f32 %v3105_v3, %v2634_v23  ;;  %v2775_v10 = vsel %vm2757_vm1, %v2734_v39, 0.0  ;;  %v2492_v46 = vpop.xlane.xlu0 %2491 }
 0x490   : > { %3792 = vlog2.f32 %v2601_v55  ;;  %v2640_v44 = vmul.f32 0.6931472, %v3779_v53  ;;  %v2736_v14 = vmul.f32 %v3105_v3, %v2636_v30 }
 0x491   : > { %v2770_v18 = vadd.f32 %v2769_v58, %v2768_v42  ;;  %v3781_v36 = vpop.eup %3780  ;;  %v2737_v4 = vmul.f32 %v3106_v61, %v2638_v0  ;;  %v2777_v25 = vsel %vm2757_vm1, %v2735_v17, 0.0  ;;  %3794 = vrcp.f32 %v5330_v41  ;;  %v5388_v58 = vld [vmem:[%s5348_s13 + $0x5] ss:$0 sm:$0xff] }
 0x492   : > { %v3783_v57 = vpop.eup %3782  ;;  %v2642_v21 = vmul.f32 0.6931472, %v3781_v36  ;;  %v2738_v6 = vmul.f32 %v3106_v61, %v2640_v44  ;;  %v2779_v13 = vsel %vm2757_vm1, %v2736_v14, 0.0  ;;  %3796 = vrcp.f32 %v5338_v20  ;;  %v2283_v27 = vpop.xlane.xlu1 %2282 }
 0x493   : > { %v2772_v33 = vadd.f32 %v2771_v12, %v2770_v18  ;;  %v2644_v37 = vmul.f32 0.6931472, %v3783_v57  ;;  %v2781_v51 = vsel %vm2757_vm1, %v2737_v4, 0.0  ;;  %3798 = vrcp.f32 %v5352_v45  ;;  %v2489_v36 = vpop.xlane.xlu0 %2488 }
 0x494   : > { %v2739_v63 = vmul.f32 %v3106_v61, %v2642_v21  ;;  %v2783_v9 = vsel %vm2757_vm1, %v2738_v6, 0.0  ;;  %3800 = vrcp.f32 %v5359_v28 }
 0x495   : > { %v2774_v49 = vadd.f32 %v2773_v52, %v2772_v33  ;;  %v3785_v1 = vpop.eup %3784  ;;  %v2740_v38 = vmul.f32 %v3106_v61, %v2644_v37  ;;  %3802 = vrcp.f32 %v5366_v31 }
 0x496   : > { %v2646_v54 = vmul.f32 0.6931472, %v3785_v1  ;;  %v2785_v5 = vsel %vm2757_vm1, %v2739_v63, 0.0  ;;  %v2286_v42 = vpop.xlane.xlu1 %2285  ;;  %3804 = vrcp.f32 %v2280_v7 }
 0x497   : > { %v2776_v60 = vadd.f32 %v2775_v10, %v2774_v49  ;;  %v3787_v8 = vpop.eup %3786  ;;  %v2787_v41 = vsel %vm2757_vm1, %v2740_v38, 0.0  ;;  %3806 = vrcp.f32 %v2286_v42  ;;  %v2495_v31 = vpop.xlane.xlu0 %2494 }
 0x498   : > { %v2648_v35 = vmul.f32 0.6931472, %v3787_v8  ;;  %v2741_v26 = vmul.f32 %v3107_v11, %v2646_v54 }
 0x499   : > { %v2778_v62 = vadd.f32 %v2777_v25, %v2776_v60  ;;  %v3789_v34 = vpop.eup %3788 }
 0x49a   : > { %v2650_v22 = vmul.f32 0.6931472, %v3789_v34  ;;  %v2742_v50 = vmul.f32 %v3107_v11, %v2648_v35  ;;  %v2789_v20 = vsel %vm2757_vm1, %v2741_v26, 0.0  ;;  %v2289_v52 = vpop.xlane.xlu1 %2288 }
 0x49b   : > { %v2780_v15 = vadd.f32 %v2779_v13, %v2778_v62  ;;  %v3791_v48 = vpop.eup %3790 }
 0x49c   : > { %v2652_v32 = vmul.f32 0.6931472, %v3791_v48  ;;  %v2743_v56 = vmul.f32 %v3107_v11, %v2650_v22  ;;  %v2791_v24 = vsel %vm2757_vm1, %v2742_v50, 0.0 }
 0x49d   : > { %v2782_v2 = vadd.f32 %v2781_v51, %v2780_v15  ;;  %v3793_v19 = vpop.eup %3792 }
 0x49e   : > { %v2654_v43 = vmul.f32 0.6931472, %v3793_v19  ;;  %v2744_v23 = vmul.f32 %v3107_v11, %v2652_v32  ;;  %v2793_v53 = vsel %vm2757_vm1, %v2743_v56, 0.0  ;;  %v3795_v45 = vpop.eup %3794  ;;  %v2292_v14 = vpop.xlane.xlu1 %2291 }
 0x49f   : > { %v2784_v47 = vadd.f32 %v2783_v9, %v2782_v2  ;;  %v3797_v30 = vpop.eup %3796  ;;  %v2570_v17 = vmul.f32 %v3795_v45, %v5325_v29 }
 0x4a0   : > { %v2745_v18 = vmul.f32 %v5388_v58, %v2654_v43  ;;  %v2795_v39 = vsel %vm2757_vm1, %v2744_v23, 0.0  ;;  %v2571_v49 = vmul.f32 %v3797_v30, %v2489_v36  ;;  %v3799_v10 = vpop.eup %3798  ;;  %v3109_v30 = vld [vmem:[%s5348_s13 + $0x6] ss:$0 sm:$0xff] }
 0x4a1   : > { %v2786_v40 = vadd.f32 %v2785_v5, %v2784_v47  ;;  %v2602_v44 = vadd.f32 1.0, %v2570_v17  ;;  %v3801_v61 = vpop.eup %3800  ;;  %v2572_v60 = vmul.f32 %v3799_v10, %v2492_v46 }
 0x4a2   : > { %v2797_v0 = vsel %vm2757_vm1, %v2745_v18, 0.0  ;;  %v2603_v57 = vadd.f32 1.0, %v2571_v49  ;;  %v2573_v25 = vmul.f32 %v3801_v61, %v2495_v31  ;;  %v3803_v21 = vpop.eup %3802 }
 0x4a3   : > { %v2788_v16 = vadd.f32 %v2787_v41, %v2786_v40  ;;  %3808 = vlog2.f32 %v2602_v44  ;;  %v2604_v1 = vadd.f32 1.0, %v2572_v60  ;;  %v3805_v13 = vpop.eup %3804 }
 0x4a4   : > { %3810 = vlog2.f32 %v2603_v57  ;;  %v2605_v6 = vadd.f32 1.0, %v2573_v25  ;;  %v3807_v15 = vpop.eup %3806 }
 0x4a5   : > { %v2790_v3 = vadd.f32 %v2789_v20, %v2788_v16  ;;  %3812 = vrcp.f32 %v2292_v14 }
 0x4a6   : > { %3814 = vrcp.f32 %v5371_v59 }
 0x4a7   : > { %v2792_v55 = vadd.f32 %v2791_v24, %v2790_v3  ;;  %3816 = vlog2.f32 %v2604_v1  ;;  %v3110_v1 = vld [vmem:[%s5348_s13 + $0x7] ss:$0 sm:$0xff] }
 0x4a8   : > { %3818 = vrcp.f32 %v2283_v27 }
 0x4a9   : > { %v2794_v12 = vadd.f32 %v2793_v53, %v2792_v55  ;;  %3820 = vlog2.f32 %v2605_v6 }
 0x4aa   : > { %3822 = vrcp.f32 %v2289_v52 }
 0x4ab   : > { %v2796_v33 = vadd.f32 %v2795_v39, %v2794_v12 }
 0x4ad   : > { %v5398_v28 = vadd.f32 %v2797_v0, %v2796_v33 }
 0x4b0   : > { %v3809_v51 = vpop.eup %3808 }
 0x4b1   : > { %v3811_v2 = vpop.eup %3810  ;;  %v2656_v59 = vmul.f32 0.6931472, %v3809_v51 }
 0x4b2   : > { %v3813_v9 = vpop.eup %3812  ;;  %v2658_v27 = vmul.f32 0.6931472, %v3811_v2 }
 0x4b3   : > { %v3815_v38 = vpop.eup %3814  ;;  %v2746_v26 = vmul.f32 %v5388_v58, %v2656_v59 }
 0x4b4   : > { %v3817_v5 = vpop.eup %3816  ;;  %v2747_v16 = vmul.f32 %v5388_v58, %v2658_v27 }
 0x4b5   : > { %v2498_v4 = vpop.xlane.xlu1 %2497  ;;  %v3819_v19 = vpop.eup %3818  ;;  %v2799_v43 = vsel %vm2757_vm1, %v2746_v26, 0.0  ;;  %v2660_v56 = vmul.f32 0.6931472, %v3817_v5 }
 0x4b6   : > { %v2574_v29 = vmul.f32 %v3803_v21, %v2498_v4  ;;  %v3821_v32 = vpop.eup %3820  ;;  %v2800_v24 = vadd.f32 %v2799_v43, %v5398_v28  ;;  %v2801_v46 = vsel %vm2757_vm1, %v2747_v16, 0.0 }
 0x4b7   : > { %v3823_v20 = vpop.eup %3822  ;;  %v2748_v18 = vmul.f32 %v5388_v58, %v2660_v56  ;;  %v2662_v53 = vmul.f32 0.6931472, %v3821_v32 }
 0x4b8   : > { %v2606_v7 = vadd.f32 1.0, %v2574_v29  ;;  %v2802_v39 = vadd.f32 %v2801_v46, %v2800_v24 }
 0x4b9   : > { %v2504_v62 = vpop.xlane.xlu1 %2503  ;;  %v2803_v52 = vsel %vm2757_vm1, %v2748_v18, 0.0  ;;  %v2749_v0 = vmul.f32 %v3109_v30, %v2662_v53 }
 0x4ba   : > { %v2576_v8 = vmul.f32 %v3805_v13, %v2504_v62  ;;  %3824 = vlog2.f32 %v2606_v7  ;;  %v2804_v28 = vadd.f32 %v2803_v52, %v2802_v39 }
 0x4bb   : > { %v2805_v44 = vsel %vm2757_vm1, %v2749_v0, 0.0 }
 0x4bc   : > { %v2608_v54 = vadd.f32 1.0, %v2576_v8  ;;  %v2806_v57 = vadd.f32 %v2805_v44, %v2804_v28 }
 0x4bd   : > { %v2510_v37 = vpop.xlane.xlu1 %2509 }
 0x4be   : > { %v2578_v63 = vmul.f32 %v3807_v15, %v2510_v37  ;;  %3826 = vlog2.f32 %v2608_v54 }
 0x4c0   : > { %v2610_v35 = vadd.f32 1.0, %v2578_v63 }
 0x4c1   : > { %v2516_v34 = vpop.xlane.xlu1 %2515 }
 0x4c2   : > { %v2580_v48 = vmul.f32 %v3813_v9, %v2516_v34  ;;  %3828 = vlog2.f32 %v2610_v35 }
 0x4c4   : > { %v2612_v40 = vadd.f32 1.0, %v2580_v48 }
 0x4c5   : > { %v2501_v11 = vpop.xlane.xlu0 %2500 }
 0x4c6   : > { %v2575_v47 = vmul.f32 %v3815_v38, %v2501_v11 }
 0x4c7   : > { %v3825_v42 = vpop.eup %3824 }
 0x4c8   : > { %v2607_v22 = vadd.f32 1.0, %v2575_v47  ;;  %v2664_v45 = vmul.f32 0.6931472, %v3825_v42 }
 0x4c9   : > { %v2507_v41 = vpop.xlane.xlu0 %2506 }
 0x4ca   : > { %3830 = vlog2.f32 %v2607_v22  ;;  %v2577_v50 = vmul.f32 %v3819_v19, %v2507_v41  ;;  %v2750_v17 = vmul.f32 %v3109_v30, %v2664_v45 }
 0x4cb   : > { %3832 = vlog2.f32 %v2612_v40  ;;  %v3827_v33 = vpop.eup %3826 }
 0x4cc   : > { %v2609_v3 = vadd.f32 1.0, %v2577_v50  ;;  %v2668_v49 = vmul.f32 0.6931472, %v3827_v33  ;;  %v2807_v58 = vsel %vm2757_vm1, %v2750_v17, 0.0 }
 0x4cd   : > { %v2513_v23 = vpop.xlane.xlu0 %2512  ;;  %v2808_v21 = vadd.f32 %v2807_v58, %v2806_v57 }
 0x4ce   : > { %3834 = vlog2.f32 %v2609_v3  ;;  %v2579_v55 = vmul.f32 %v3823_v20, %v2513_v23  ;;  %v2752_v60 = vmul.f32 %v3109_v30, %v2668_v49 }
 0x4cf   : > { %v3829_v36 = vpop.eup %3828 }
 0x4d0   : > { %v2611_v12 = vadd.f32 1.0, %v2579_v55  ;;  %v2672_v31 = vmul.f32 0.6931472, %v3829_v36  ;;  %v2811_v7 = vsel %vm2757_vm1, %v2752_v60, 0.0 }
 0x4d2   : > { %3836 = vlog2.f32 %v2611_v12  ;;  %v2754_v13 = vmul.f32 %v3110_v1, %v2672_v31 }
 0x4d4   : > { %v2815_v59 = vsel %vm2757_vm1, %v2754_v13, 0.0 }
 0x4d7   : > { %v3831_v10 = vpop.eup %3830 }
 0x4d8   : > { %v2666_v14 = vmul.f32 0.6931472, %v3831_v10  ;;  %v3833_v61 = vpop.eup %3832 }
 0x4d9   : > { %v2676_v37 = vmul.f32 0.6931472, %v3833_v61 }
 0x4da   : > { %v2751_v4 = vmul.f32 %v3109_v30, %v2666_v14 }
 0x4db   : > { %v3835_v25 = vpop.eup %3834  ;;  %v2756_v9 = vmul.f32 %v3110_v1, %v2676_v37 }
 0x4dc   : > { %v2809_v29 = vsel %vm2757_vm1, %v2751_v4, 0.0  ;;  %v2670_v62 = vmul.f32 0.6931472, %v3835_v25 }
 0x4dd   : > { %v2810_v6 = vadd.f32 %v2809_v29, %v2808_v21  ;;  %v2819_v11 = vsel %vm2757_vm1, %v2756_v9, 0.0 }
 0x4de   : > { %v2753_v8 = vmul.f32 %v3110_v1, %v2670_v62 }
 0x4df   : > { %v3837_v15 = vpop.eup %3836  ;;  %v2812_v51 = vadd.f32 %v2811_v7, %v2810_v6 }
 0x4e0   : > { %v2813_v63 = vsel %vm2757_vm1, %v2753_v8, 0.0  ;;  %v2674_v54 = vmul.f32 0.6931472, %v3837_v15 }
 0x4e1   : > { %v2814_v34 = vadd.f32 %v2813_v63, %v2812_v51 }
 0x4e2   : > { %v2755_v2 = vmul.f32 %v3110_v1, %v2674_v54 }
 0x4e3   : > { %v2816_v38 = vadd.f32 %v2815_v59, %v2814_v34 }
 0x4e4   : > { %v2817_v35 = vsel %vm2757_vm1, %v2755_v2, 0.0 }
 0x4e5   : > { %v2818_v48 = vadd.f32 %v2817_v35, %v2816_v38 }
 0x4e7   : > { %v2820_v47 = vadd.f32 %v2819_v11, %v2818_v48 }
 0x4e9   : > { %2821 = vadd.xlane.f32.xlu0 %v2820_v47 }
 0x572   : > { %v2822_v27 = vpop.xlane.xlu0 %2821 }
 0x573   : > { %v2823_v5 = vrot.slane %v2822_v27, 4 }
 0x575   : > { %v2824_v26 = vadd.f32 %v2823_v5, %v2822_v27 }
 0x577   : > { %v2825_v22 = vrot.slane %v2824_v26, 2 }
 0x579   : > { %v2826_v19 = vadd.f32 %v2825_v22, %v2824_v26 }
 0x57b   : > { %v2827_v40 = vrot.slane %v2826_v19, 1 }
 0x57d   : > { %v2828_v41 = vadd.f32 %v2827_v40, %v2826_v19 }
 0x57f   : > { %3393 = vpush %v2828_v41 }
 0x5b0   : > { %s3394_s20 = spop %3393 }
 0x5b1   : > { %v2830_v50 = vstv %s3394_s20 }
 0x5b2   : > { %2831 = vst [vmem:[%s350_s8] sm:$0xff] %v2830_v50 }
 0x5b3   : > { %3953 = shalt.err (!%p3950_p13)
}
 0x5b4   : > { %s3954_s17 = scalar_lea.hbm %s2844_s9, 128  ;;  %s3958_s6 = scalar_lea.hbm %s5464_s5, 384 }
 0x5b5   : > { %p3955_p3 = scmp.ne.s32.totalorder %s2844_s9, %s3954_s17  ;;  %p3959_p1 = scmp.lt.s32.totalorder %s2844_s9, %s5464_s5 }
 0x5b6   : > { %p3960_p5 = scmp.lt.s32.totalorder %s3958_s6, %s3954_s17 }
 0x5b7   : > { %p3956_p10 = pnand %p3955_p3, %p5512_p8 }
 0x5b8   : > { %p3961_p12 = por %p3960_p5, %p3959_p1 }
 0x5b9   : > { %p3957_p4 = pneg %p3956_p10 }
 0x5bb   : > { %p3962_p7 = pnand %p3961_p12, %p3957_p4 }
 0x5bd   : > { %3965 = shalt.err (!%p3962_p7)
}
 0x5be   : > { %3401 = dma.vmem_to_hbm [thread:$0]  (%p5512_p8), %s5420_s11, 128, %s2844_s9, %s2833_s16  }
 0x5bf PF: > { %p3418_p9 = scmp.ge.s32.totalorder %s4008_s21, 2  ;;  %s2858_s26 = sand.u32 1, %s3996_s18  }
 0x5c0   : > { %p5513_p0 = scmp.ne.s32.totalorder %s5486_s30, 0  ;;  %s2859_s13 = scalar_lea.sflag [#allocation4], %s2858_s26 }
 0x5c2   : > { %p3414_p2 = pnand %p3418_p9, %p5513_p0 }
 0x5c4   : > { %p3415_p11 = pneg %p3414_p2 }
 0x5c6   : > { %3991 = dma.done.wait (%p3415_p11), %s2859_s13, 128  }
 0x5c7   : > { %3993 = vsyncadd (%p3415_p11), %s2859_s13, 4294967168  ;;  %s5514_s7 = sld [smem:[#allocation12_spill]]  ;;  %p21_p6 = scmp.ge.s32.totalorder %s4072_s24, 5  }
 0x5c8   : > { %s5515_s20 = sld [smem:[#allocation13_spill]]  ;;  %s5516_s18 = smov %s4000_s19 }
 0x5c9   : > { %s5518_s21 = smov %s4072_s24  ;;  %23 = sbr.rel (!%p21_p6) target bundleno = 10 (0xa), region = 115 }
 0x5cd   : > { %s5517_s19 = smov %s5514_s7 }
 0x5ce   :  { %2864 = vsyncpa [#allocation3], 1 }
 0x5cf   :  { %2866 = vsyncpa [#allocation3 + $0x1], 1 }
 0x5d0   :  { %2867 = vsyncpa [#allocation6], 1 }
 0x5d1   :  { %2869 = vsyncpa [#allocation6 + $0x1], 1 }
 0x5d2   :  { %2870 = vsyncpa [#allocation4], 1 }
 0x5d3   :  { %2872 = vsyncpa [#allocation4 + $0x1], 1 }

</bundles_post_ra>
